<compile_context>
chip_gen: v7x
topology: tpu7x:2x2x1
jax: 0.10.0
libtpu: 0.0.40
codegen_flags: <defaults>
</compile_context>

<pallas_src>
import functools

import jax
import jax.numpy as jnp
from jax import lax
from jax.experimental import pallas as pl
from jax.experimental.pallas import tpu as pltpu

IMG_DIM = 256     # hard-coded in the module: ImageJointfeaturefusion(256, 128)
FUSE_DIM = 128    # per-joint fused feature dim
MID_DIM = 1024    # HMRLayer hidden dim (hard-coded 1024 in the module)
N_ITER = 3

HAND_SPECS = {"pose_6d": 96, "shape": 10, "cam_t/wp": 3}   # 96 = 16 joints * 6d rot
OBJ_SPECS = {"rot": 3, "radian": 1, "cam_t/wp": 3}

# Lane-padded HMR state width (109 for hands, 7 for object -> 128).
V_PAD = ((max(sum(HAND_SPECS.values()), sum(OBJ_SPECS.values())) + 127) // 128) * 128


# ---------------------------------------------------------------------------
# Kernel 1: fused image/joint feature fusion for ALL THREE branches (r, l, o).
# Grid is over batch tiles of size TB.  Per batch element:
#   - bilinear sampling of img_feat at the stacked joints is one
#     (J_total, HW) x (HW, 256) MXU matmul,
#   - each branch's fusion linear (img / field / j3d + bias, ReLU) is applied to
#     its row slice with 2D matmuls against that branch's weights.
# ---------------------------------------------------------------------------
def _fusion_kernel(img_ref, j2d_ref, field_ref, j3d_ref, px_ref, py_ref,
                   w_img_ref, w_field_ref, w_j3d_ref, bias_ref, out_ref,
                   *, H, W, joint_counts):
    px = px_ref[...]          # (1, HW) pixel x-coords of the flattened grid
    py = py_ref[...]          # (1, HW)
    TB = img_ref.shape[0]

    for t in range(TB):       # static unroll over the batch tile
        img_t = img_ref[t]        # (HW, Cimg)
        j2d_t = j2d_ref[t]        # (J_total, 2) normalized in [-1, 1]
        field_t = field_ref[t]    # (J_total, Cf)
        j3d_t = j3d_ref[t]        # (J_total, 3)

        # align_corners=True convention for grid_sample-style sampling.
        # TODO(synk): switch to align_corners=False / border padding if the
        # reference ImageJointfeaturefusion uses a different convention.
        x = (j2d_t[:, 0:1] + 1.0) * 0.5 * (W - 1)   # (J_total, 1)
        y = (j2d_t[:, 1:2] + 1.0) * 0.5 * (H - 1)   # (J_total, 1)

        wx = jnp.maximum(1.0 - jnp.abs(x - px), 0.0)   # (J_total, HW)
        wy = jnp.maximum(1.0 - jnp.abs(y - py), 0.0)
        wts = wx * wy                                   # bilinear weights

        sampled = jnp.dot(wts, img_t,
                          preferred_element_type=jnp.float32)   # (J_total, Cimg)

        off = 0
        for bi, Jb in enumerate(joint_counts):
            sl = slice(off, off + Jb)
            fused = (jnp.dot(sampled[sl], w_img_ref[bi],
                             preferred_element_type=jnp.float32)
                     + jnp.dot(field_t[sl], w_field_ref[bi],
                               preferred_element_type=jnp.float32)
                     + jnp.dot(j3d_t[sl], w_j3d_ref[bi],
                               preferred_element_type=jnp.float32)
                     + bias_ref[bi])
            out_ref[t, sl, :] = jnp.maximum(fused, 0.0)   # (Jb, FUSE_DIM)
            off += Jb


def _pick_batch_tile(B, per_elem_bytes, max_tb=8, budget=8 * 1024 * 1024):
    """Largest divisor of B (<= max_tb) whose double-buffered block fits budget."""
    tb = 1
    for d in range(1, min(B, max_tb) + 1):
        if B % d == 0 and 2 * d * per_elem_bytes <= budget:
            tb = d
    return tb


def fuse_img_joint_features(img_feat_nchw, field_all, j2d_all, j3d_all,
                            fuse_params, joint_counts):
    B, C, H, W = img_feat_nchw.shape
    HW = H * W
    J_total = j2d_all.shape[1]
    Cf = field_all.shape[2]

    # One NCHW -> (B, HW, C) transpose shared by all three branches.
    img_flat = jnp.transpose(img_feat_nchw, (0, 2, 3, 1)).reshape(B, HW, C)

    # Lane-dense pixel coordinates of the flattened grid (row-major h*W + w).
    xs = jnp.arange(W, dtype=jnp.float32)
    ys = jnp.arange(H, dtype=jnp.float32)
    px = jnp.tile(xs, (H,)).reshape(1, HW)
    py = jnp.repeat(ys, W).reshape(1, HW)

    per_elem_bytes = 4 * (HW * C + J_total * (2 + Cf + 3 + FUSE_DIM))
    TB = _pick_batch_tile(B, per_elem_bytes)

    kernel = functools.partial(_fusion_kernel, H=H, W=W,
                               joint_counts=tuple(joint_counts))
    return pl.pallas_call(
        kernel,
        out_shape=jax.ShapeDtypeStruct((B, J_total, FUSE_DIM), jnp.float32),
        grid=(B // TB,),
        in_specs=[
            pl.BlockSpec((TB, HW, C), lambda b: (b, 0, 0)),
            pl.BlockSpec((TB, J_total, 2), lambda b: (b, 0, 0)),
            pl.BlockSpec((TB, J_total, Cf), lambda b: (b, 0, 0)),
            pl.BlockSpec((TB, J_total, 3), lambda b: (b, 0, 0)),
            pl.BlockSpec((1, HW), lambda b: (0, 0)),
            pl.BlockSpec((1, HW), lambda b: (0, 0)),
            pl.BlockSpec((3, C, FUSE_DIM), lambda b: (0, 0, 0)),
            pl.BlockSpec((3, Cf, FUSE_DIM), lambda b: (0, 0, 0)),
            pl.BlockSpec((3, 3, FUSE_DIM), lambda b: (0, 0, 0)),
            pl.BlockSpec((3, 1, FUSE_DIM), lambda b: (0, 0, 0)),
        ],
        out_specs=pl.BlockSpec((TB, J_total, FUSE_DIM), lambda b: (b, 0, 0)),
        compiler_params=pltpu.CompilerParams(
            dimension_semantics=("parallel",)),
    )(img_flat, j2d_all, field_all, j3d_all, px, py,
      fuse_params["w_img"], fuse_params["w_field"],
      fuse_params["w_j3d"], fuse_params["bias"])


# ---------------------------------------------------------------------------
# Kernel 2: fused 3-branch HMRLayer — grid=(3,) over stacked, padded weights.
# Per branch: 3 iterations of
#   xc = [feat, vec] -> Linear -> ReLU -> Linear -> ReLU -> decoders ; vec += delta
# The concat-linear is split into feat@W1f (loop-invariant, hoisted) + vec@W1v.
# All per-key decoders are stacked into one (MID, V_PAD) matrix.  Dropout is
# eval-mode identity.  w1_feat / w2 are bf16 weights with f32 accumulation.
# ---------------------------------------------------------------------------
def _hmr_fused_kernel(feat_ref, vec_ref, w1f_ref, w1v_ref, b1_ref,
                      w2_ref, b2_ref, wd_ref, bd_ref, out_ref, *, n_iter):
    feat = feat_ref[0].astype(jnp.bfloat16)          # (B, F_max)

    # Loop-invariant part of layer 1, computed once per branch.
    pre = (jnp.dot(feat, w1f_ref[0], preferred_element_type=jnp.float32)
           + b1_ref[0])                              # (B, MID) f32

    w1v = w1v_ref[0]   # (V_PAD, MID) f32
    w2 = w2_ref[0]     # (MID, MID)  bf16
    b2 = b2_ref[0]     # (1, MID)    f32
    wd = wd_ref[0]     # (MID, V_PAD) f32
    bd = bd_ref[0]     # (1, V_PAD)   f32

    def body(_, vec):
        h = jnp.maximum(
            pre + jnp.dot(vec, w1v, preferred_element_type=jnp.float32), 0.0)
        h = jnp.maximum(
            jnp.dot(h.astype(jnp.bfloat16), w2,
                    preferred_element_type=jnp.float32) + b2, 0.0)
        delta = jnp.dot(h, wd, preferred_element_type=jnp.float32) + bd
        return vec + delta

    out_ref[0] = lax.fori_loop(0, n_iter, body, vec_ref[0], unroll=True)


def hmr_layer_fused(feat_all, vec_all, hmr_params, n_iter=N_ITER):
    G, B, F_max = feat_all.shape
    VP = vec_all.shape[2]
    MID = hmr_params["w2"].shape[1]

    kernel = functools.partial(_hmr_fused_kernel, n_iter=n_iter)
    return pl.pallas_call(
        kernel,
        out_shape=jax.ShapeDtypeStruct((G, B, VP), jnp.float32),
        grid=(G,),
        in_specs=[
            pl.BlockSpec((1, B, F_max), lambda g: (g, 0, 0)),
            pl.BlockSpec((1, B, VP), lambda g: (g, 0, 0)),
            pl.BlockSpec((1, F_max, MID), lambda g: (g, 0, 0)),
            pl.BlockSpec((1, VP, MID), lambda g: (g, 0, 0)),
            pl.BlockSpec((1, 1, MID), lambda g: (g, 0, 0)),
            pl.BlockSpec((1, MID, MID), lambda g: (g, 0, 0)),
            pl.BlockSpec((1, 1, MID), lambda g: (g, 0, 0)),
            pl.BlockSpec((1, MID, VP), lambda g: (g, 0, 0)),
            pl.BlockSpec((1, 1, VP), lambda g: (g, 0, 0)),
        ],
        out_specs=pl.BlockSpec((1, B, VP), lambda g: (g, 0, 0)),
        compiler_params=pltpu.CompilerParams(
            dimension_semantics=("parallel",),
            vmem_limit_bytes=32 * 1024 * 1024),
    )(feat_all, vec_all,
      hmr_params["w1_feat"], hmr_params["w1_vec"], hmr_params["b1"],
      hmr_params["w2"], hmr_params["b2"],
      hmr_params["w_dec"], hmr_params["b_dec"])


# ---------------------------------------------------------------------------
# Glue: rotation_6d_to_matrix (tiny elementwise, plain JAX) and parameter init.
# ---------------------------------------------------------------------------
def rotation_6d_to_matrix(d6):
    a1, a2 = d6[..., :3], d6[..., 3:]
    b1 = a1 / jnp.linalg.norm(a1, axis=-1, keepdims=True)
    b2 = a2 - jnp.sum(b1 * a2, axis=-1, keepdims=True) * b1
    b2 = b2 / jnp.linalg.norm(b2, axis=-1, keepdims=True)
    b3 = jnp.cross(b1, b2)
    return jnp.stack((b1, b2, b3), axis=-2)


def init_refinement_params(key, hand_joint_num, object_joint_num, field_dim):
    keys = iter(jax.random.split(key, 128))

    def p(shape, scale=0.02):
        return scale * jax.random.normal(next(keys), shape, dtype=jnp.float32)

    # --- fusion params, stacked along the branch axis (order: r, l, o) ---
    fuse = {
        "w_img": jnp.stack([p((IMG_DIM, FUSE_DIM)) for _ in range(3)]),
        "w_field": jnp.stack([p((field_dim, FUSE_DIM)) for _ in range(3)]),
        "w_j3d": jnp.stack([p((3, FUSE_DIM)) for _ in range(3)]),
        "bias": jnp.stack([p((1, FUSE_DIM)) for _ in range(3)]),
    }

    # --- HMR params, stacked along the branch axis and zero-padded so all
    #     branches share (F_max, V_PAD) shapes ---
    F_max = FUSE_DIM * max(hand_joint_num, object_joint_num)

    def hmr_branch(joint_num, specs):
        F = FUSE_DIM * joint_num
        V = sum(specs.values())
        w1_feat = jnp.pad(p((F, MID_DIM)), ((0, F_max - F), (0, 0)))
        w1_vec = jnp.pad(p((V, MID_DIM)), ((0, V_PAD - V), (0, 0)))
        b1 = p((1, MID_DIM))
        w2 = p((MID_DIM, MID_DIM))
        b2 = p((1, MID_DIM))
        w_dec = jnp.pad(p((MID_DIM, V), scale=0.002), ((0, 0), (0, V_PAD - V)))
        b_dec = jnp.zeros((1, V_PAD), jnp.float32)
        return (w1_feat, w1_vec, b1, w2, b2, w_dec, b_dec)

    branches = [hmr_branch(hand_joint_num, HAND_SPECS),
                hmr_branch(hand_joint_num, HAND_SPECS),
                hmr_branch(object_joint_num, OBJ_SPECS)]
    stk = lambda i: jnp.stack([b[i] for b in branches])
    hmr = {
        "w1_feat": stk(0).astype(jnp.bfloat16),   # big weights in bf16, f32 accum
        "w1_vec": stk(1),                          # small state-path weights stay f32
        "b1": stk(2),
        "w2": stk(3).astype(jnp.bfloat16),
        "b2": stk(4),
        "w_dec": stk(5),
        "b_dec": stk(6),
    }
    return {"fuse": fuse, "hmr": hmr}


def refinement_forward(params, hand_joint_num, object_joint_num,
                       img_feat, field_feat_r, field_feat_l, field_feat_o,
                       mano_output_r, mano_output_l, arti_output,
                       hmr_output_r, hmr_output_l, hmr_output_o):
    B = img_feat.shape[0]
    HJ, OJ = hand_joint_num, object_joint_num

    # ---- fused image/joint feature fusion for the three branches ----
    j2d_all = jnp.concatenate([mano_output_r["j2d.norm.r"],
                               mano_output_l["j2d.norm.l"],
                               arti_output["kp2d.norm"]], axis=1)
    j3d_all = jnp.concatenate([mano_output_r["j3d.cam.r"],
                               mano_output_l["j3d.cam.l"],
                               arti_output["kp3d.cam"]], axis=1)
    field_all = jnp.concatenate([field_feat_r, field_feat_l, field_feat_o], axis=1)

    fused_all = fuse_img_joint_features(img_feat, field_all, j2d_all, j3d_all,
                                        params["fuse"], (HJ, HJ, OJ))
    img_feat_r = fused_all[:, :HJ]
    img_feat_l = fused_all[:, HJ:2 * HJ]
    img_feat_o = fused_all[:, 2 * HJ:]

    # ---- fused 3-branch HMR refinement ----
    F_max = FUSE_DIM * max(HJ, OJ)

    def pad_feat(f):
        return jnp.pad(f, ((0, 0), (0, F_max - f.shape[1])))

    feat_all = jnp.stack([pad_feat(img_feat_r.reshape(B, FUSE_DIM * HJ)),
                          pad_feat(img_feat_l.reshape(B, FUSE_DIM * HJ)),
                          pad_feat(img_feat_o.reshape(B, FUSE_DIM * OJ))], axis=0)

    refine_dict_r = {"pose_6d": hmr_output_r["pose_6d"],
                     "shape": hmr_output_r["shape"],
                     "cam_t/wp": hmr_output_r["cam_t.wp"]}
    refine_dict_l = {"pose_6d": hmr_output_l["pose_6d"],
                     "shape": hmr_output_l["shape"],
                     "cam_t/wp": hmr_output_l["cam_t.wp"]}
    refine_dict_o = {"rot": hmr_output_o["rot"],
                     "radian": hmr_output_o["radian"],
                     "cam_t/wp": hmr_output_o["cam_t.wp"]}

    def pad_vec(d, specs):
        v = jnp.concatenate([d[k] for k in specs], axis=1)
        return jnp.pad(v, ((0, 0), (0, V_PAD - v.shape[1])))

    vec_all = jnp.stack([pad_vec(refine_dict_r, HAND_SPECS),
                         pad_vec(refine_dict_l, HAND_SPECS),
                         pad_vec(refine_dict_o, OBJ_SPECS)], axis=0)

    out_all = hmr_layer_fused(feat_all, vec_all, params["hmr"])   # (3, B, V_PAD)

    def split(vec, specs):
        out, off = {}, 0
        for k, sz in specs.items():
            out[k] = vec[:, off:off + sz]
            off += sz
        return out

    ref_r = split(out_all[0], HAND_SPECS)
    ref_l = split(out_all[1], HAND_SPECS)
    ref_o = split(out_all[2], OBJ_SPECS)

    ref_r["pose"] = rotation_6d_to_matrix(ref_r["pose_6d"].reshape(-1, 6)).reshape(B, 16, 3, 3)
    ref_l["pose"] = rotation_6d_to_matrix(ref_l["pose_6d"].reshape(-1, 6)).reshape(B, 16, 3, 3)

    ref_r = {k.replace("/", "."): v for k, v in ref_r.items()}
    ref_l = {k.replace("/", "."): v for k, v in ref_l.items()}
    ref_o = {k.replace("/", "."): v for k, v in ref_o.items()}

    return ref_r, ref_l, ref_o, img_feat_r, img_feat_l, img_feat_o, img_feat


# ---------------------------------------------------------------------------
if __name__ == "__main__":
    B, H, W = 2, 8, 8
    HAND_J, OBJ_J = 8, 4      # constructor args hand_joint_num / object_joint_num
    FIELD_DIM = 64            # per-joint field-feature dim (not fixed by the module)

    key = jax.random.PRNGKey(0)
    ks = iter(jax.random.split(key, 32))

    params = init_refinement_params(next(ks), HAND_J, OBJ_J, FIELD_DIM)

    img_feat = jax.random.normal(next(ks), (B, IMG_DIM, H, W), jnp.float32)
    field_feat_r = jax.random.normal(next(ks), (B, HAND_J, FIELD_DIM), jnp.float32)
    field_feat_l = jax.random.normal(next(ks), (B, HAND_J, FIELD_DIM), jnp.float32)
    field_feat_o = jax.random.normal(next(ks), (B, OBJ_J, FIELD_DIM), jnp.float32)

    mano_output_r = {
        "j2d.norm.r": jax.random.uniform(next(ks), (B, HAND_J, 2), minval=-1.0, maxval=1.0),
        "j3d.cam.r": jax.random.normal(next(ks), (B, HAND_J, 3), jnp.float32),
    }
    mano_output_l = {
        "j2d.norm.l": jax.random.uniform(next(ks), (B, HAND_J, 2), minval=-1.0, maxval=1.0),
        "j3d.cam.l": jax.random.normal(next(ks), (B, HAND_J, 3), jnp.float32),
    }
    arti_output = {
        "kp2d.norm": jax.random.uniform(next(ks), (B, OBJ_J, 2), minval=-1.0, maxval=1.0),
        "kp3d.cam": jax.random.normal(next(ks), (B, OBJ_J, 3), jnp.float32),
    }
    hmr_output_r = {
        "pose_6d": jax.random.normal(next(ks), (B, 96), jnp.float32),
        "shape": jax.random.normal(next(ks), (B, 10), jnp.float32),
        "cam_t.wp": jax.random.normal(next(ks), (B, 3), jnp.float32),
    }
    hmr_output_l = {
        "pose_6d": jax.random.normal(next(ks), (B, 96), jnp.float32),
        "shape": jax.random.normal(next(ks), (B, 10), jnp.float32),
        "cam_t.wp": jax.random.normal(next(ks), (B, 3), jnp.float32),
    }
    hmr_output_o = {
        "rot": jax.random.normal(next(ks), (B, 3), jnp.float32),
        "radian": jax.random.normal(next(ks), (B, 1), jnp.float32),
        "cam_t.wp": jax.random.normal(next(ks), (B, 3), jnp.float32),
    }

    outs = refinement_forward(params, HAND_J, OBJ_J,
                              img_feat, field_feat_r, field_feat_l, field_feat_o,
                              mano_output_r, mano_output_l, arti_output,
                              hmr_output_r, hmr_output_l, hmr_output_o)
    jax.block_until_ready(outs)

    ref_r, ref_l, ref_o, fr, fl, fo, _ = outs
    assert ref_r["pose"].shape == (B, 16, 3, 3)
    assert ref_l["pose"].shape == (B, 16, 3, 3)
    assert ref_o["cam_t.wp"].shape == (B, 3)
    assert fr.shape == (B, HAND_J, FUSE_DIM) and fo.shape == (B, OBJ_J, FUSE_DIM)
    assert bool(jnp.all(jnp.isfinite(ref_r["cam_t.wp"])))
    print("KERNEL_OK")
</pallas_src>

<mosaic_0001>
module attributes {stable_mosaic.version = 11 : i64} {
  func.func @_fusion_kernel(%arg0: i32, %arg1: memref<2x64x256xf32, #tpu.memory_space<vmem>>, %arg2: memref<2x20x2xf32, #tpu.memory_space<vmem>>, %arg3: memref<2x20x64xf32, #tpu.memory_space<vmem>>, %arg4: memref<2x20x3xf32, #tpu.memory_space<vmem>>, %arg5: memref<1x64xf32, #tpu.memory_space<vmem>>, %arg6: memref<1x64xf32, #tpu.memory_space<vmem>>, %arg7: memref<3x256x128xf32, #tpu.memory_space<vmem>>, %arg8: memref<3x64x128xf32, #tpu.memory_space<vmem>>, %arg9: memref<3x3x128xf32, #tpu.memory_space<vmem>>, %arg10: memref<3x1x128xf32, #tpu.memory_space<vmem>>, %arg11: memref<2x20x128xf32, #tpu.memory_space<vmem>>) attributes {dimension_semantics = [#tpu.dimension_semantics<parallel>], iteration_bounds = array<i64: 1>, scalar_prefetch = 0 : i64, scratch_operands = 0 : i64, tpu.core_type = #tpu.core_type<tc>, window_params = [{transform_indices = @transform_0, window_bounds = array<i64: 2, 64, 256>}, {transform_indices = @transform_1, window_bounds = array<i64: 2, 20, 2>}, {transform_indices = @transform_2, window_bounds = array<i64: 2, 20, 64>}, {transform_indices = @transform_3, window_bounds = array<i64: 2, 20, 3>}, {pipeline_mode = #tpu.pipeline_mode<synchronous>, transform_indices = @transform_4, window_bounds = array<i64: 1, 64>}, {pipeline_mode = #tpu.pipeline_mode<synchronous>, transform_indices = @transform_5, window_bounds = array<i64: 1, 64>}, {pipeline_mode = #tpu.pipeline_mode<synchronous>, transform_indices = @transform_6, window_bounds = array<i64: 3, 256, 128>}, {pipeline_mode = #tpu.pipeline_mode<synchronous>, transform_indices = @transform_7, window_bounds = array<i64: 3, 64, 128>}, {pipeline_mode = #tpu.pipeline_mode<synchronous>, transform_indices = @transform_8, window_bounds = array<i64: 3, 3, 128>}, {pipeline_mode = #tpu.pipeline_mode<synchronous>, transform_indices = @transform_9, window_bounds = array<i64: 3, 1, 128>}, {transform_indices = @transform_10, window_bounds = array<i64: 2, 20, 128>}]} {
    %c0 = arith.constant 0 : index
    %c0_0 = arith.constant 0 : index
    %0 = vector.load %arg5[%c0, %c0_0] : memref<1x64xf32, #tpu.memory_space<vmem>>, vector<1x64xf32>
    %c0_1 = arith.constant 0 : index
    %c0_2 = arith.constant 0 : index
    %1 = vector.load %arg6[%c0_1, %c0_2] : memref<1x64xf32, #tpu.memory_space<vmem>>, vector<1x64xf32>
    %c0_3 = arith.constant 0 : index
    %c0_4 = arith.constant 0 : index
    %c0_5 = arith.constant 0 : index
    %2 = vector.load %arg1[%c0_3, %c0_4, %c0_5] : memref<2x64x256xf32, #tpu.memory_space<vmem>>, vector<1x64x256xf32>
    %3 = vector.shape_cast %2 : vector<1x64x256xf32> to vector<64x256xf32>
    %c0_6 = arith.constant 0 : index
    %c0_7 = arith.constant 0 : index
    %c0_8 = arith.constant 0 : index
    %4 = vector.load %arg2[%c0_6, %c0_7, %c0_8] : memref<2x20x2xf32, #tpu.memory_space<vmem>>, vector<1x20x2xf32>
    %5 = vector.shape_cast %4 : vector<1x20x2xf32> to vector<20x2xf32>
    %c0_9 = arith.constant 0 : index
    %c0_10 = arith.constant 0 : index
    %c0_11 = arith.constant 0 : index
    %6 = vector.load %arg3[%c0_9, %c0_10, %c0_11] : memref<2x20x64xf32, #tpu.memory_space<vmem>>, vector<1x20x64xf32>
    %7 = vector.shape_cast %6 : vector<1x20x64xf32> to vector<20x64xf32>
    %c0_12 = arith.constant 0 : index
    %c0_13 = arith.constant 0 : index
    %c0_14 = arith.constant 0 : index
    %8 = vector.load %arg4[%c0_12, %c0_13, %c0_14] : memref<2x20x3xf32, #tpu.memory_space<vmem>>, vector<1x20x3xf32>
    %9 = vector.shape_cast %8 : vector<1x20x3xf32> to vector<20x3xf32>
    %10 = vector.extract_strided_slice %5 {offsets = [0, 0], sizes = [20, 1], strides = [1, 1]} : vector<20x2xf32> to vector<20x1xf32>
    %cst = arith.constant 1.000000e+00 : f32
    %11 = vector.broadcast %cst : f32 to vector<20x1xf32>
    %12 = arith.addf %10, %11 : vector<20x1xf32>
    %cst_15 = arith.constant 5.000000e-01 : f32
    %13 = vector.broadcast %cst_15 : f32 to vector<20x1xf32>
    %14 = arith.mulf %12, %13 : vector<20x1xf32>
    %cst_16 = arith.constant 7.000000e+00 : f32
    %15 = vector.broadcast %cst_16 : f32 to vector<20x1xf32>
    %16 = arith.mulf %14, %15 : vector<20x1xf32>
    %17 = vector.extract_strided_slice %5 {offsets = [0, 1], sizes = [20, 1], strides = [1, 1]} : vector<20x2xf32> to vector<20x1xf32>
    %cst_17 = arith.constant 1.000000e+00 : f32
    %18 = vector.broadcast %cst_17 : f32 to vector<20x1xf32>
    %19 = arith.addf %17, %18 : vector<20x1xf32>
    %cst_18 = arith.constant 5.000000e-01 : f32
    %20 = vector.broadcast %cst_18 : f32 to vector<20x1xf32>
    %21 = arith.mulf %19, %20 : vector<20x1xf32>
    %cst_19 = arith.constant 7.000000e+00 : f32
    %22 = vector.broadcast %cst_19 : f32 to vector<20x1xf32>
    %23 = arith.mulf %21, %22 : vector<20x1xf32>
    %24 = vector.broadcast %16 : vector<20x1xf32> to vector<20x64xf32>
    %25 = vector.broadcast %0 : vector<1x64xf32> to vector<20x64xf32>
    %26 = arith.subf %24, %25 : vector<20x64xf32>
    %27 = math.absf %26 : vector<20x64xf32>
    %cst_20 = arith.constant 1.000000e+00 : f32
    %28 = vector.broadcast %cst_20 : f32 to vector<20x64xf32>
    %29 = arith.subf %28, %27 : vector<20x64xf32>
    %cst_21 = arith.constant 0.000000e+00 : f32
    %30 = vector.broadcast %cst_21 : f32 to vector<20x64xf32>
    %31 = arith.maximumf %29, %30 : vector<20x64xf32>
    %32 = vector.broadcast %23 : vector<20x1xf32> to vector<20x64xf32>
    %33 = vector.broadcast %1 : vector<1x64xf32> to vector<20x64xf32>
    %34 = arith.subf %32, %33 : vector<20x64xf32>
    %35 = math.absf %34 : vector<20x64xf32>
    %cst_22 = arith.constant 1.000000e+00 : f32
    %36 = vector.broadcast %cst_22 : f32 to vector<20x64xf32>
    %37 = arith.subf %36, %35 : vector<20x64xf32>
    %cst_23 = arith.constant 0.000000e+00 : f32
    %38 = vector.broadcast %cst_23 : f32 to vector<20x64xf32>
    %39 = arith.maximumf %37, %38 : vector<20x64xf32>
    %40 = arith.mulf %31, %39 : vector<20x64xf32>
    %cst_24 = arith.constant dense<0.000000e+00> : vector<20x256xf32>
    %41 = tpu.matmul %40, %3, %cst_24 {dimension_numbers = #tpu.dot_dimension_numbers<[1], [0], [0], [1], [0, 0, 1, 1], [], []>} : vector<20x64xf32>, vector<64x256xf32>, vector<20x256xf32> -> vector<20x256xf32>
    %42 = vector.extract_strided_slice %41 {offsets = [0, 0], sizes = [8, 256], strides = [1, 1]} : vector<20x256xf32> to vector<8x256xf32>
    %c0_25 = arith.constant 0 : index
    %c0_26 = arith.constant 0 : index
    %c0_27 = arith.constant 0 : index
    %43 = vector.load %arg7[%c0_25, %c0_26, %c0_27] : memref<3x256x128xf32, #tpu.memory_space<vmem>>, vector<1x256x128xf32>
    %44 = vector.shape_cast %43 : vector<1x256x128xf32> to vector<256x128xf32>
    %cst_28 = arith.constant dense<0.000000e+00> : vector<8x128xf32>
    %45 = tpu.matmul %42, %44, %cst_28 {dimension_numbers = #tpu.dot_dimension_numbers<[1], [0], [0], [1], [0, 0, 1, 1], [], []>} : vector<8x256xf32>, vector<256x128xf32>, vector<8x128xf32> -> vector<8x128xf32>
    %46 = vector.extract_strided_slice %7 {offsets = [0, 0], sizes = [8, 64], strides = [1, 1]} : vector<20x64xf32> to vector<8x64xf32>
    %c0_29 = arith.constant 0 : index
    %c0_30 = arith.constant 0 : index
    %c0_31 = arith.constant 0 : index
    %47 = vector.load %arg8[%c0_29, %c0_30, %c0_31] : memref<3x64x128xf32, #tpu.memory_space<vmem>>, vector<1x64x128xf32>
    %48 = vector.shape_cast %47 : vector<1x64x128xf32> to vector<64x128xf32>
    %cst_32 = arith.constant dense<0.000000e+00> : vector<8x128xf32>
    %49 = tpu.matmul %46, %48, %cst_32 {dimension_numbers = #tpu.dot_dimension_numbers<[1], [0], [0], [1], [0, 0, 1, 1], [], []>} : vector<8x64xf32>, vector<64x128xf32>, vector<8x128xf32> -> vector<8x128xf32>
    %50 = arith.addf %45, %49 : vector<8x128xf32>
    %51 = vector.extract_strided_slice %9 {offsets = [0, 0], sizes = [8, 3], strides = [1, 1]} : vector<20x3xf32> to vector<8x3xf32>
    %c0_33 = arith.constant 0 : index
    %c0_34 = arith.constant 0 : index
    %c0_35 = arith.constant 0 : index
    %52 = vector.load %arg9[%c0_33, %c0_34, %c0_35] : memref<3x3x128xf32, #tpu.memory_space<vmem>>, vector<1x3x128xf32>
    %53 = vector.shape_cast %52 : vector<1x3x128xf32> to vector<3x128xf32>
    %cst_36 = arith.constant dense<0.000000e+00> : vector<8x128xf32>
    %54 = tpu.matmul %51, %53, %cst_36 {dimension_numbers = #tpu.dot_dimension_numbers<[1], [0], [0], [1], [0, 0, 1, 1], [], []>} : vector<8x3xf32>, vector<3x128xf32>, vector<8x128xf32> -> vector<8x128xf32>
    %55 = arith.addf %50, %54 : vector<8x128xf32>
    %c0_37 = arith.constant 0 : index
    %c0_38 = arith.constant 0 : index
    %c0_39 = arith.constant 0 : index
    %56 = vector.load %arg10[%c0_37, %c0_38, %c0_39] : memref<3x1x128xf32, #tpu.memory_space<vmem>>, vector<1x1x128xf32>
    %57 = vector.shape_cast %56 : vector<1x1x128xf32> to vector<1x128xf32>
    %58 = vector.broadcast %57 : vector<1x128xf32> to vector<8x128xf32>
    %59 = arith.addf %55, %58 : vector<8x128xf32>
    %cst_40 = arith.constant 0.000000e+00 : f32
    %60 = vector.broadcast %cst_40 : f32 to vector<8x128xf32>
    %61 = arith.maximumf %59, %60 : vector<8x128xf32>
    %c0_41 = arith.constant 0 : index
    %c0_42 = arith.constant 0 : index
    %c0_43 = arith.constant 0 : index
    %62 = vector.load %arg11[%c0_41, %c0_42, %c0_43] : memref<2x20x128xf32, #tpu.memory_space<vmem>>, vector<1x8x128xf32>
    %63 = vector.shape_cast %62 : vector<1x8x128xf32> to vector<8x128xf32>
    %64 = vector.shape_cast %61 : vector<8x128xf32> to vector<1x8x128xf32>
    tpu.vector_store %arg11[%c0_41, %c0_42, %c0_43], %64 {strides = array<i32>} : memref<2x20x128xf32, #tpu.memory_space<vmem>>, vector<1x8x128xf32>,
    %65 = vector.extract_strided_slice %41 {offsets = [8, 0], sizes = [8, 256], strides = [1, 1]} : vector<20x256xf32> to vector<8x256xf32>
    %c1 = arith.constant 1 : index
    %c0_44 = arith.constant 0 : index
    %c0_45 = arith.constant 0 : index
    %66 = vector.load %arg7[%c1, %c0_44, %c0_45] : memref<3x256x128xf32, #tpu.memory_space<vmem>>, vector<1x256x128xf32>
    %67 = vector.shape_cast %66 : vector<1x256x128xf32> to vector<256x128xf32>
    %cst_46 = arith.constant dense<0.000000e+00> : vector<8x128xf32>
    %68 = tpu.matmul %65, %67, %cst_46 {dimension_numbers = #tpu.dot_dimension_numbers<[1], [0], [0], [1], [0, 0, 1, 1], [], []>} : vector<8x256xf32>, vector<256x128xf32>, vector<8x128xf32> -> vector<8x128xf32>
    %69 = vector.extract_strided_slice %7 {offsets = [8, 0], sizes = [8, 64], strides = [1, 1]} : vector<20x64xf32> to vector<8x64xf32>
    %c1_47 = arith.constant 1 : index
    %c0_48 = arith.constant 0 : index
    %c0_49 = arith.constant 0 : index
    %70 = vector.load %arg8[%c1_47, %c0_48, %c0_49] : memref<3x64x128xf32, #tpu.memory_space<vmem>>, vector<1x64x128xf32>
    %71 = vector.shape_cast %70 : vector<1x64x128xf32> to vector<64x128xf32>
    %cst_50 = arith.constant dense<0.000000e+00> : vector<8x128xf32>
    %72 = tpu.matmul %69, %71, %cst_50 {dimension_numbers = #tpu.dot_dimension_numbers<[1], [0], [0], [1], [0, 0, 1, 1], [], []>} : vector<8x64xf32>, vector<64x128xf32>, vector<8x128xf32> -> vector<8x128xf32>
    %73 = arith.addf %68, %72 : vector<8x128xf32>
    %74 = vector.extract_strided_slice %9 {offsets = [8, 0], sizes = [8, 3], strides = [1, 1]} : vector<20x3xf32> to vector<8x3xf32>
    %c1_51 = arith.constant 1 : index
    %c0_52 = arith.constant 0 : index
    %c0_53 = arith.constant 0 : index
    %75 = vector.load %arg9[%c1_51, %c0_52, %c0_53] : memref<3x3x128xf32, #tpu.memory_space<vmem>>, vector<1x3x128xf32>
    %76 = vector.shape_cast %75 : vector<1x3x128xf32> to vector<3x128xf32>
    %cst_54 = arith.constant dense<0.000000e+00> : vector<8x128xf32>
    %77 = tpu.matmul %74, %76, %cst_54 {dimension_numbers = #tpu.dot_dimension_numbers<[1], [0], [0], [1], [0, 0, 1, 1], [], []>} : vector<8x3xf32>, vector<3x128xf32>, vector<8x128xf32> -> vector<8x128xf32>
    %78 = arith.addf %73, %77 : vector<8x128xf32>
    %c1_55 = arith.constant 1 : index
    %c0_56 = arith.constant 0 : index
    %c0_57 = arith.constant 0 : index
    %79 = vector.load %arg10[%c1_55, %c0_56, %c0_57] : memref<3x1x128xf32, #tpu.memory_space<vmem>>, vector<1x1x128xf32>
    %80 = vector.shape_cast %79 : vector<1x1x128xf32> to vector<1x128xf32>
    %81 = vector.broadcast %80 : vector<1x128xf32> to vector<8x128xf32>
    %82 = arith.addf %78, %81 : vector<8x128xf32>
    %cst_58 = arith.constant 0.000000e+00 : f32
    %83 = vector.broadcast %cst_58 : f32 to vector<8x128xf32>
    %84 = arith.maximumf %82, %83 : vector<8x128xf32>
    %c0_59 = arith.constant 0 : index
    %c8 = arith.constant 8 : index
    %c0_60 = arith.constant 0 : index
    %85 = vector.load %arg11[%c0_59, %c8, %c0_60] : memref<2x20x128xf32, #tpu.memory_space<vmem>>, vector<1x8x128xf32>
    %86 = vector.shape_cast %85 : vector<1x8x128xf32> to vector<8x128xf32>
    %87 = vector.shape_cast %84 : vector<8x128xf32> to vector<1x8x128xf32>
    tpu.vector_store %arg11[%c0_59, %c8, %c0_60], %87 {strides = array<i32>} : memref<2x20x128xf32, #tpu.memory_space<vmem>>, vector<1x8x128xf32>,
    %88 = vector.extract_strided_slice %41 {offsets = [16, 0], sizes = [4, 256], strides = [1, 1]} : vector<20x256xf32> to vector<4x256xf32>
    %c2 = arith.constant 2 : index
    %c0_61 = arith.constant 0 : index
    %c0_62 = arith.constant 0 : index
    %89 = vector.load %arg7[%c2, %c0_61, %c0_62] : memref<3x256x128xf32, #tpu.memory_space<vmem>>, vector<1x256x128xf32>
    %90 = vector.shape_cast %89 : vector<1x256x128xf32> to vector<256x128xf32>
    %cst_63 = arith.constant dense<0.000000e+00> : vector<4x128xf32>
    %91 = tpu.matmul %88, %90, %cst_63 {dimension_numbers = #tpu.dot_dimension_numbers<[1], [0], [0], [1], [0, 0, 1, 1], [], []>} : vector<4x256xf32>, vector<256x128xf32>, vector<4x128xf32> -> vector<4x128xf32>
    %92 = vector.extract_strided_slice %7 {offsets = [16, 0], sizes = [4, 64], strides = [1, 1]} : vector<20x64xf32> to vector<4x64xf32>
    %c2_64 = arith.constant 2 : index
    %c0_65 = arith.constant 0 : index
    %c0_66 = arith.constant 0 : index
    %93 = vector.load %arg8[%c2_64, %c0_65, %c0_66] : memref<3x64x128xf32, #tpu.memory_space<vmem>>, vector<1x64x128xf32>
    %94 = vector.shape_cast %93 : vector<1x64x128xf32> to vector<64x128xf32>
    %cst_67 = arith.constant dense<0.000000e+00> : vector<4x128xf32>
    %95 = tpu.matmul %92, %94, %cst_67 {dimension_numbers = #tpu.dot_dimension_numbers<[1], [0], [0], [1], [0, 0, 1, 1], [], []>} : vector<4x64xf32>, vector<64x128xf32>, vector<4x128xf32> -> vector<4x128xf32>
    %96 = arith.addf %91, %95 : vector<4x128xf32>
    %97 = vector.extract_strided_slice %9 {offsets = [16, 0], sizes = [4, 3], strides = [1, 1]} : vector<20x3xf32> to vector<4x3xf32>
    %c2_68 = arith.constant 2 : index
    %c0_69 = arith.constant 0 : index
    %c0_70 = arith.constant 0 : index
    %98 = vector.load %arg9[%c2_68, %c0_69, %c0_70] : memref<3x3x128xf32, #tpu.memory_space<vmem>>, vector<1x3x128xf32>
    %99 = vector.shape_cast %98 : vector<1x3x128xf32> to vector<3x128xf32>
    %cst_71 = arith.constant dense<0.000000e+00> : vector<4x128xf32>
    %100 = tpu.matmul %97, %99, %cst_71 {dimension_numbers = #tpu.dot_dimension_numbers<[1], [0], [0], [1], [0, 0, 1, 1], [], []>} : vector<4x3xf32>, vector<3x128xf32>, vector<4x128xf32> -> vector<4x128xf32>
    %101 = arith.addf %96, %100 : vector<4x128xf32>
    %c2_72 = arith.constant 2 : index
    %c0_73 = arith.constant 0 : index
    %c0_74 = arith.constant 0 : index
    %102 = vector.load %arg10[%c2_72, %c0_73, %c0_74] : memref<3x1x128xf32, #tpu.memory_space<vmem>>, vector<1x1x128xf32>
    %103 = vector.shape_cast %102 : vector<1x1x128xf32> to vector<1x128xf32>
    %104 = vector.broadcast %103 : vector<1x128xf32> to vector<4x128xf32>
    %105 = arith.addf %101, %104 : vector<4x128xf32>
    %cst_75 = arith.constant 0.000000e+00 : f32
    %106 = vector.broadcast %cst_75 : f32 to vector<4x128xf32>
    %107 = arith.maximumf %105, %106 : vector<4x128xf32>
    %c0_76 = arith.constant 0 : index
    %c16 = arith.constant 16 : index
    %c0_77 = arith.constant 0 : index
    %108 = vector.load %arg11[%c0_76, %c16, %c0_77] : memref<2x20x128xf32, #tpu.memory_space<vmem>>, vector<1x4x128xf32>
    %109 = vector.shape_cast %108 : vector<1x4x128xf32> to vector<4x128xf32>
    %110 = vector.shape_cast %107 : vector<4x128xf32> to vector<1x4x128xf32>
    tpu.vector_store %arg11[%c0_76, %c16, %c0_77], %110 {strides = array<i32>} : memref<2x20x128xf32, #tpu.memory_space<vmem>>, vector<1x4x128xf32>,
    %c1_78 = arith.constant 1 : index
    %c0_79 = arith.constant 0 : index
    %c0_80 = arith.constant 0 : index
    %111 = vector.load %arg1[%c1_78, %c0_79, %c0_80] : memref<2x64x256xf32, #tpu.memory_space<vmem>>, vector<1x64x256xf32>
    %112 = vector.shape_cast %111 : vector<1x64x256xf32> to vector<64x256xf32>
    %c1_81 = arith.constant 1 : index
    %c0_82 = arith.constant 0 : index
    %c0_83 = arith.constant 0 : index
    %113 = vector.load %arg2[%c1_81, %c0_82, %c0_83] : memref<2x20x2xf32, #tpu.memory_space<vmem>>, vector<1x20x2xf32>
    %114 = vector.shape_cast %113 : vector<1x20x2xf32> to vector<20x2xf32>
    %c1_84 = arith.constant 1 : index
    %c0_85 = arith.constant 0 : index
    %c0_86 = arith.constant 0 : index
    %115 = vector.load %arg3[%c1_84, %c0_85, %c0_86] : memref<2x20x64xf32, #tpu.memory_space<vmem>>, vector<1x20x64xf32>
    %116 = vector.shape_cast %115 : vector<1x20x64xf32> to vector<20x64xf32>
    %c1_87 = arith.constant 1 : index
    %c0_88 = arith.constant 0 : index
    %c0_89 = arith.constant 0 : index
    %117 = vector.load %arg4[%c1_87, %c0_88, %c0_89] : memref<2x20x3xf32, #tpu.memory_space<vmem>>, vector<1x20x3xf32>
    %118 = vector.shape_cast %117 : vector<1x20x3xf32> to vector<20x3xf32>
    %119 = vector.extract_strided_slice %114 {offsets = [0, 0], sizes = [20, 1], strides = [1, 1]} : vector<20x2xf32> to vector<20x1xf32>
    %cst_90 = arith.constant 1.000000e+00 : f32
    %120 = vector.broadcast %cst_90 : f32 to vector<20x1xf32>
    %121 = arith.addf %119, %120 : vector<20x1xf32>
    %cst_91 = arith.constant 5.000000e-01 : f32
    %122 = vector.broadcast %cst_91 : f32 to vector<20x1xf32>
    %123 = arith.mulf %121, %122 : vector<20x1xf32>
    %cst_92 = arith.constant 7.000000e+00 : f32
    %124 = vector.broadcast %cst_92 : f32 to vector<20x1xf32>
    %125 = arith.mulf %123, %124 : vector<20x1xf32>
    %126 = vector.extract_strided_slice %114 {offsets = [0, 1], sizes = [20, 1], strides = [1, 1]} : vector<20x2xf32> to vector<20x1xf32>
    %cst_93 = arith.constant 1.000000e+00 : f32
    %127 = vector.broadcast %cst_93 : f32 to vector<20x1xf32>
    %128 = arith.addf %126, %127 : vector<20x1xf32>
    %cst_94 = arith.constant 5.000000e-01 : f32
    %129 = vector.broadcast %cst_94 : f32 to vector<20x1xf32>
    %130 = arith.mulf %128, %129 : vector<20x1xf32>
    %cst_95 = arith.constant 7.000000e+00 : f32
    %131 = vector.broadcast %cst_95 : f32 to vector<20x1xf32>
    %132 = arith.mulf %130, %131 : vector<20x1xf32>
    %133 = vector.broadcast %125 : vector<20x1xf32> to vector<20x64xf32>
    %134 = vector.broadcast %0 : vector<1x64xf32> to vector<20x64xf32>
    %135 = arith.subf %133, %134 : vector<20x64xf32>
    %136 = math.absf %135 : vector<20x64xf32>
    %cst_96 = arith.constant 1.000000e+00 : f32
    %137 = vector.broadcast %cst_96 : f32 to vector<20x64xf32>
    %138 = arith.subf %137, %136 : vector<20x64xf32>
    %cst_97 = arith.constant 0.000000e+00 : f32
    %139 = vector.broadcast %cst_97 : f32 to vector<20x64xf32>
    %140 = arith.maximumf %138, %139 : vector<20x64xf32>
    %141 = vector.broadcast %132 : vector<20x1xf32> to vector<20x64xf32>
    %142 = vector.broadcast %1 : vector<1x64xf32> to vector<20x64xf32>
    %143 = arith.subf %141, %142 : vector<20x64xf32>
    %144 = math.absf %143 : vector<20x64xf32>
    %cst_98 = arith.constant 1.000000e+00 : f32
    %145 = vector.broadcast %cst_98 : f32 to vector<20x64xf32>
    %146 = arith.subf %145, %144 : vector<20x64xf32>
    %cst_99 = arith.constant 0.000000e+00 : f32
    %147 = vector.broadcast %cst_99 : f32 to vector<20x64xf32>
    %148 = arith.maximumf %146, %147 : vector<20x64xf32>
    %149 = arith.mulf %140, %148 : vector<20x64xf32>
    %cst_100 = arith.constant dense<0.000000e+00> : vector<20x256xf32>
    %150 = tpu.matmul %149, %112, %cst_100 {dimension_numbers = #tpu.dot_dimension_numbers<[1], [0], [0], [1], [0, 0, 1, 1], [], []>} : vector<20x64xf32>, vector<64x256xf32>, vector<20x256xf32> -> vector<20x256xf32>
    %151 = vector.extract_strided_slice %150 {offsets = [0, 0], sizes = [8, 256], strides = [1, 1]} : vector<20x256xf32> to vector<8x256xf32>
    %c0_101 = arith.constant 0 : index
    %c0_102 = arith.constant 0 : index
    %c0_103 = arith.constant 0 : index
    %152 = vector.load %arg7[%c0_101, %c0_102, %c0_103] : memref<3x256x128xf32, #tpu.memory_space<vmem>>, vector<1x256x128xf32>
    %153 = vector.shape_cast %152 : vector<1x256x128xf32> to vector<256x128xf32>
    %cst_104 = arith.constant dense<0.000000e+00> : vector<8x128xf32>
    %154 = tpu.matmul %151, %153, %cst_104 {dimension_numbers = #tpu.dot_dimension_numbers<[1], [0], [0], [1], [0, 0, 1, 1], [], []>} : vector<8x256xf32>, vector<256x128xf32>, vector<8x128xf32> -> vector<8x128xf32>
    %155 = vector.extract_strided_slice %116 {offsets = [0, 0], sizes = [8, 64], strides = [1, 1]} : vector<20x64xf32> to vector<8x64xf32>
    %c0_105 = arith.constant 0 : index
    %c0_106 = arith.constant 0 : index
    %c0_107 = arith.constant 0 : index
    %156 = vector.load %arg8[%c0_105, %c0_106, %c0_107] : memref<3x64x128xf32, #tpu.memory_space<vmem>>, vector<1x64x128xf32>
    %157 = vector.shape_cast %156 : vector<1x64x128xf32> to vector<64x128xf32>
    %cst_108 = arith.constant dense<0.000000e+00> : vector<8x128xf32>
    %158 = tpu.matmul %155, %157, %cst_108 {dimension_numbers = #tpu.dot_dimension_numbers<[1], [0], [0], [1], [0, 0, 1, 1], [], []>} : vector<8x64xf32>, vector<64x128xf32>, vector<8x128xf32> -> vector<8x128xf32>
    %159 = arith.addf %154, %158 : vector<8x128xf32>
    %160 = vector.extract_strided_slice %118 {offsets = [0, 0], sizes = [8, 3], strides = [1, 1]} : vector<20x3xf32> to vector<8x3xf32>
    %c0_109 = arith.constant 0 : index
    %c0_110 = arith.constant 0 : index
    %c0_111 = arith.constant 0 : index
    %161 = vector.load %arg9[%c0_109, %c0_110, %c0_111] : memref<3x3x128xf32, #tpu.memory_space<vmem>>, vector<1x3x128xf32>
    %162 = vector.shape_cast %161 : vector<1x3x128xf32> to vector<3x128xf32>
    %cst_112 = arith.constant dense<0.000000e+00> : vector<8x128xf32>
    %163 = tpu.matmul %160, %162, %cst_112 {dimension_numbers = #tpu.dot_dimension_numbers<[1], [0], [0], [1], [0, 0, 1, 1], [], []>} : vector<8x3xf32>, vector<3x128xf32>, vector<8x128xf32> -> vector<8x128xf32>
    %164 = arith.addf %159, %163 : vector<8x128xf32>
    %c0_113 = arith.constant 0 : index
    %c0_114 = arith.constant 0 : index
    %c0_115 = arith.constant 0 : index
    %165 = vector.load %arg10[%c0_113, %c0_114, %c0_115] : memref<3x1x128xf32, #tpu.memory_space<vmem>>, vector<1x1x128xf32>
    %166 = vector.shape_cast %165 : vector<1x1x128xf32> to vector<1x128xf32>
    %167 = vector.broadcast %166 : vector<1x128xf32> to vector<8x128xf32>
    %168 = arith.addf %164, %167 : vector<8x128xf32>
    %cst_116 = arith.constant 0.000000e+00 : f32
    %169 = vector.broadcast %cst_116 : f32 to vector<8x128xf32>
    %170 = arith.maximumf %168, %169 : vector<8x128xf32>
    %c1_117 = arith.constant 1 : index
    %c0_118 = arith.constant 0 : index
    %c0_119 = arith.constant 0 : index
    %171 = vector.load %arg11[%c1_117, %c0_118, %c0_119] : memref<2x20x128xf32, #tpu.memory_space<vmem>>, vector<1x8x128xf32>
    %172 = vector.shape_cast %171 : vector<1x8x128xf32> to vector<8x128xf32>
    %173 = vector.shape_cast %170 : vector<8x128xf32> to vector<1x8x128xf32>
    tpu.vector_store %arg11[%c1_117, %c0_118, %c0_119], %173 {strides = array<i32>} : memref<2x20x128xf32, #tpu.memory_space<vmem>>, vector<1x8x128xf32>,
    %174 = vector.extract_strided_slice %150 {offsets = [8, 0], sizes = [8, 256], strides = [1, 1]} : vector<20x256xf32> to vector<8x256xf32>
    %c1_120 = arith.constant 1 : index
    %c0_121 = arith.constant 0 : index
    %c0_122 = arith.constant 0 : index
    %175 = vector.load %arg7[%c1_120, %c0_121, %c0_122] : memref<3x256x128xf32, #tpu.memory_space<vmem>>, vector<1x256x128xf32>
    %176 = vector.shape_cast %175 : vector<1x256x128xf32> to vector<256x128xf32>
    %cst_123 = arith.constant dense<0.000000e+00> : vector<8x128xf32>
    %177 = tpu.matmul %174, %176, %cst_123 {dimension_numbers = #tpu.dot_dimension_numbers<[1], [0], [0], [1], [0, 0, 1, 1], [], []>} : vector<8x256xf32>, vector<256x128xf32>, vector<8x128xf32> -> vector<8x128xf32>
    %178 = vector.extract_strided_slice %116 {offsets = [8, 0], sizes = [8, 64], strides = [1, 1]} : vector<20x64xf32> to vector<8x64xf32>
    %c1_124 = arith.constant 1 : index
    %c0_125 = arith.constant 0 : index
    %c0_126 = arith.constant 0 : index
    %179 = vector.load %arg8[%c1_124, %c0_125, %c0_126] : memref<3x64x128xf32, #tpu.memory_space<vmem>>, vector<1x64x128xf32>
    %180 = vector.shape_cast %179 : vector<1x64x128xf32> to vector<64x128xf32>
    %cst_127 = arith.constant dense<0.000000e+00> : vector<8x128xf32>
    %181 = tpu.matmul %178, %180, %cst_127 {dimension_numbers = #tpu.dot_dimension_numbers<[1], [0], [0], [1], [0, 0, 1, 1], [], []>} : vector<8x64xf32>, vector<64x128xf32>, vector<8x128xf32> -> vector<8x128xf32>
    %182 = arith.addf %177, %181 : vector<8x128xf32>
    %183 = vector.extract_strided_slice %118 {offsets = [8, 0], sizes = [8, 3], strides = [1, 1]} : vector<20x3xf32> to vector<8x3xf32>
    %c1_128 = arith.constant 1 : index
    %c0_129 = arith.constant 0 : index
    %c0_130 = arith.constant 0 : index
    %184 = vector.load %arg9[%c1_128, %c0_129, %c0_130] : memref<3x3x128xf32, #tpu.memory_space<vmem>>, vector<1x3x128xf32>
    %185 = vector.shape_cast %184 : vector<1x3x128xf32> to vector<3x128xf32>
    %cst_131 = arith.constant dense<0.000000e+00> : vector<8x128xf32>
    %186 = tpu.matmul %183, %185, %cst_131 {dimension_numbers = #tpu.dot_dimension_numbers<[1], [0], [0], [1], [0, 0, 1, 1], [], []>} : vector<8x3xf32>, vector<3x128xf32>, vector<8x128xf32> -> vector<8x128xf32>
    %187 = arith.addf %182, %186 : vector<8x128xf32>
    %c1_132 = arith.constant 1 : index
    %c0_133 = arith.constant 0 : index
    %c0_134 = arith.constant 0 : index
    %188 = vector.load %arg10[%c1_132, %c0_133, %c0_134] : memref<3x1x128xf32, #tpu.memory_space<vmem>>, vector<1x1x128xf32>
    %189 = vector.shape_cast %188 : vector<1x1x128xf32> to vector<1x128xf32>
    %190 = vector.broadcast %189 : vector<1x128xf32> to vector<8x128xf32>
    %191 = arith.addf %187, %190 : vector<8x128xf32>
    %cst_135 = arith.constant 0.000000e+00 : f32
    %192 = vector.broadcast %cst_135 : f32 to vector<8x128xf32>
    %193 = arith.maximumf %191, %192 : vector<8x128xf32>
    %c1_136 = arith.constant 1 : index
    %c8_137 = arith.constant 8 : index
    %c0_138 = arith.constant 0 : index
    %194 = vector.load %arg11[%c1_136, %c8_137, %c0_138] : memref<2x20x128xf32, #tpu.memory_space<vmem>>, vector<1x8x128xf32>
    %195 = vector.shape_cast %194 : vector<1x8x128xf32> to vector<8x128xf32>
    %196 = vector.shape_cast %193 : vector<8x128xf32> to vector<1x8x128xf32>
    tpu.vector_store %arg11[%c1_136, %c8_137, %c0_138], %196 {strides = array<i32>} : memref<2x20x128xf32, #tpu.memory_space<vmem>>, vector<1x8x128xf32>,
    %197 = vector.extract_strided_slice %150 {offsets = [16, 0], sizes = [4, 256], strides = [1, 1]} : vector<20x256xf32> to vector<4x256xf32>
    %c2_139 = arith.constant 2 : index
    %c0_140 = arith.constant 0 : index
    %c0_141 = arith.constant 0 : index
    %198 = vector.load %arg7[%c2_139, %c0_140, %c0_141] : memref<3x256x128xf32, #tpu.memory_space<vmem>>, vector<1x256x128xf32>
    %199 = vector.shape_cast %198 : vector<1x256x128xf32> to vector<256x128xf32>
    %cst_142 = arith.constant dense<0.000000e+00> : vector<4x128xf32>
    %200 = tpu.matmul %197, %199, %cst_142 {dimension_numbers = #tpu.dot_dimension_numbers<[1], [0], [0], [1], [0, 0, 1, 1], [], []>} : vector<4x256xf32>, vector<256x128xf32>, vector<4x128xf32> -> vector<4x128xf32>
    %201 = vector.extract_strided_slice %116 {offsets = [16, 0], sizes = [4, 64], strides = [1, 1]} : vector<20x64xf32> to vector<4x64xf32>
    %c2_143 = arith.constant 2 : index
    %c0_144 = arith.constant 0 : index
    %c0_145 = arith.constant 0 : index
    %202 = vector.load %arg8[%c2_143, %c0_144, %c0_145] : memref<3x64x128xf32, #tpu.memory_space<vmem>>, vector<1x64x128xf32>
    %203 = vector.shape_cast %202 : vector<1x64x128xf32> to vector<64x128xf32>
    %cst_146 = arith.constant dense<0.000000e+00> : vector<4x128xf32>
    %204 = tpu.matmul %201, %203, %cst_146 {dimension_numbers = #tpu.dot_dimension_numbers<[1], [0], [0], [1], [0, 0, 1, 1], [], []>} : vector<4x64xf32>, vector<64x128xf32>, vector<4x128xf32> -> vector<4x128xf32>
    %205 = arith.addf %200, %204 : vector<4x128xf32>
    %206 = vector.extract_strided_slice %118 {offsets = [16, 0], sizes = [4, 3], strides = [1, 1]} : vector<20x3xf32> to vector<4x3xf32>
    %c2_147 = arith.constant 2 : index
    %c0_148 = arith.constant 0 : index
    %c0_149 = arith.constant 0 : index
    %207 = vector.load %arg9[%c2_147, %c0_148, %c0_149] : memref<3x3x128xf32, #tpu.memory_space<vmem>>, vector<1x3x128xf32>
    %208 = vector.shape_cast %207 : vector<1x3x128xf32> to vector<3x128xf32>
    %cst_150 = arith.constant dense<0.000000e+00> : vector<4x128xf32>
    %209 = tpu.matmul %206, %208, %cst_150 {dimension_numbers = #tpu.dot_dimension_numbers<[1], [0], [0], [1], [0, 0, 1, 1], [], []>} : vector<4x3xf32>, vector<3x128xf32>, vector<4x128xf32> -> vector<4x128xf32>
    %210 = arith.addf %205, %209 : vector<4x128xf32>
    %c2_151 = arith.constant 2 : index
    %c0_152 = arith.constant 0 : index
    %c0_153 = arith.constant 0 : index
    %211 = vector.load %arg10[%c2_151, %c0_152, %c0_153] : memref<3x1x128xf32, #tpu.memory_space<vmem>>, vector<1x1x128xf32>
    %212 = vector.shape_cast %211 : vector<1x1x128xf32> to vector<1x128xf32>
    %213 = vector.broadcast %212 : vector<1x128xf32> to vector<4x128xf32>
    %214 = arith.addf %210, %213 : vector<4x128xf32>
    %cst_154 = arith.constant 0.000000e+00 : f32
    %215 = vector.broadcast %cst_154 : f32 to vector<4x128xf32>
    %216 = arith.maximumf %214, %215 : vector<4x128xf32>
    %c1_155 = arith.constant 1 : index
    %c16_156 = arith.constant 16 : index
    %c0_157 = arith.constant 0 : index
    %217 = vector.load %arg11[%c1_155, %c16_156, %c0_157] : memref<2x20x128xf32, #tpu.memory_space<vmem>>, vector<1x4x128xf32>
    %218 = vector.shape_cast %217 : vector<1x4x128xf32> to vector<4x128xf32>
    %219 = vector.shape_cast %216 : vector<4x128xf32> to vector<1x4x128xf32>
    tpu.vector_store %arg11[%c1_155, %c16_156, %c0_157], %219 {strides = array<i32>} : memref<2x20x128xf32, #tpu.memory_space<vmem>>, vector<1x4x128xf32>,
    return
  }
  func.func @transform_0(%arg0: i32) -> (i32, i32, i32) {
    %c0_i32 = arith.constant 0 : i32
    %c0_i32_0 = arith.constant 0 : i32
    %c0_i32_1 = arith.constant 0 : i32
    return %arg0, %c0_i32, %c0_i32_0 : i32, i32, i32
  }
  func.func @transform_1(%arg0: i32) -> (i32, i32, i32) {
    %c0_i32 = arith.constant 0 : i32
    %c0_i32_0 = arith.constant 0 : i32
    %c0_i32_1 = arith.constant 0 : i32
    return %arg0, %c0_i32, %c0_i32_0 : i32, i32, i32
  }
  func.func @transform_2(%arg0: i32) -> (i32, i32, i32) {
    %c0_i32 = arith.constant 0 : i32
    %c0_i32_0 = arith.constant 0 : i32
    %c0_i32_1 = arith.constant 0 : i32
    return %arg0, %c0_i32, %c0_i32_0 : i32, i32, i32
  }
  func.func @transform_3(%arg0: i32) -> (i32, i32, i32) {
    %c0_i32 = arith.constant 0 : i32
    %c0_i32_0 = arith.constant 0 : i32
    %c0_i32_1 = arith.constant 0 : i32
    return %arg0, %c0_i32, %c0_i32_0 : i32, i32, i32
  }
  func.func @transform_4(%arg0: i32) -> (i32, i32) {
    %c0_i32 = arith.constant 0 : i32
    %c0_i32_0 = arith.constant 0 : i32
    %c0_i32_1 = arith.constant 0 : i32
    return %c0_i32, %c0_i32_0 : i32, i32
  }
  func.func @transform_5(%arg0: i32) -> (i32, i32) {
    %c0_i32 = arith.constant 0 : i32
    %c0_i32_0 = arith.constant 0 : i32
    %c0_i32_1 = arith.constant 0 : i32
    return %c0_i32, %c0_i32_0 : i32, i32
  }
  func.func @transform_6(%arg0: i32) -> (i32, i32, i32) {
    %c0_i32 = arith.constant 0 : i32
    %c0_i32_0 = arith.constant 0 : i32
    %c0_i32_1 = arith.constant 0 : i32
    %c0_i32_2 = arith.constant 0 : i32
    return %c0_i32, %c0_i32_0, %c0_i32_1 : i32, i32, i32
  }
  func.func @transform_7(%arg0: i32) -> (i32, i32, i32) {
    %c0_i32 = arith.constant 0 : i32
    %c0_i32_0 = arith.constant 0 : i32
    %c0_i32_1 = arith.constant 0 : i32
    %c0_i32_2 = arith.constant 0 : i32
    return %c0_i32, %c0_i32_0, %c0_i32_1 : i32, i32, i32
  }
  func.func @transform_8(%arg0: i32) -> (i32, i32, i32) {
    %c0_i32 = arith.constant 0 : i32
    %c0_i32_0 = arith.constant 0 : i32
    %c0_i32_1 = arith.constant 0 : i32
    %c0_i32_2 = arith.constant 0 : i32
    return %c0_i32, %c0_i32_0, %c0_i32_1 : i32, i32, i32
  }
  func.func @transform_9(%arg0: i32) -> (i32, i32, i32) {
    %c0_i32 = arith.constant 0 : i32
    %c0_i32_0 = arith.constant 0 : i32
    %c0_i32_1 = arith.constant 0 : i32
    %c0_i32_2 = arith.constant 0 : i32
    return %c0_i32, %c0_i32_0, %c0_i32_1 : i32, i32, i32
  }
  func.func @transform_10(%arg0: i32) -> (i32, i32, i32) {
    %c0_i32 = arith.constant 0 : i32
    %c0_i32_0 = arith.constant 0 : i32
    %c0_i32_1 = arith.constant 0 : i32
    return %arg0, %c0_i32, %c0_i32_0 : i32, i32, i32
  }
}

</mosaic_0001>

<bundles_post_ra>
// kernel: tpu_custom_call.1
= control target key start
LH: loop header
LB: loop body
LE: loop exit
PB: predicated region body
PF: predicated region fallthrough
CT: control target
= control target key end

     0   :  { %15 = vsyncpa [#allocation3], 0  ;;  %s3585_s0 = inlined_call_operand.hbm [shape: f32[2,64,256], index: 0, kind: input, shape index: {}]   ;;  %s3586_s1 = inlined_call_operand.vmem [shape: f32[2,20,2], index: 1, kind: input, shape index: {}]   ;;  %s3587_s2 = inlined_call_operand.vmem [shape: f32[2,20,64], index: 2, kind: input, shape index: {}]   ;;  %s3588_s3 = inlined_call_operand.vmem [shape: f32[2,20,3], index: 3, kind: input, shape index: {}]   ;;  %s3589_s4 = inlined_call_operand.vmem [shape: f32[1,64], index: 4, kind: input, shape index: {}]   ;;  %s3590_s5 = inlined_call_operand.vmem [shape: f32[1,64], index: 5, kind: input, shape index: {}]   ;;  %s3591_s6 = inlined_call_operand.hbm [shape: f32[3,256,128], index: 6, kind: input, shape index: {}]   ;;  %s3592_s7 = inlined_call_operand.vmem [shape: f32[3,64,128], index: 7, kind: input, shape index: {}]   ;;  %s3593_s8 = inlined_call_operand.vmem [shape: f32[3,3,128], index: 8, kind: input, shape index: {}]   ;;  %s3594_s9 = inlined_call_operand.vmem [shape: f32[3,1,128], index: 9, kind: input, shape index: {}]   ;;  %s3595_s10 = inlined_call_operand.vmem [shape: f32[2,20,128], index: 10, kind: output, shape index: {}]  }
   0x1   :  { %16 = vsyncpa [#allocation5], 0  ;;  %s2949_s13 = smov [#allocation2]   ;;  %s2901_s17 = scalar_lea.hbm %s3585_s0, 4096 }
   0x2   :  { %s22_s14 = sshll.u32 %s2949_s13, 4  ;;  %p2902_p0 = scmp.ne.s32.totalorder %s3585_s0, %s2901_s17  ;;  %s23_s14 = int_to_ptr.vmem [resolvable:$true] %s22_s14 }
   0x3   :  { %p2905_p1 = scmp.lt.u32.totalorder %s2901_s17, %s3585_s0 }
   0x5   :  { %p2907_p2 = pnand %p2905_p1, %p2902_p0 }
   0x7   :  { %2910 = shalt.err (!%p2907_p2)
}
   0x8   :  { %s2911_s22 = scalar_lea.vmem %s23_s14, 4096  ;;  %p2916_p4 = scmp.lt.s32.totalorder %s23_s14, %s23_s14 }
   0x9   :  { %p2912_p3 = scmp.ne.s32.totalorder %s23_s14, %s2911_s22  ;;  %p2917_p5 = scmp.lt.s32.totalorder %s2911_s22, %s2911_s22 }
   0xb   :  { %p2918_p6 = por %p2917_p5, %p2916_p4 }
   0xd   :  { %p2919_p7 = pnand %p2918_p6, %p2912_p3 }
   0xf   :  { %2922 = shalt.err (!%p2919_p7)
}
  0x10   :  { %s2950_s23 = smov 256   ;;  %s2951_s24 = smov 16  }
  0x11   :  { %28 = dma.hbm_to_vmem [thread:$0]  %s3585_s0, 4096, %s23_s14, [#allocation3], %s2950_s23, %s2950_s23, %s2951_s24  }
  0x12   :  { %s2952_s27 = smov [#allocation4]   ;;  %s2923_s11 = scalar_lea.hbm %s3591_s6, 12288 }
  0x13   :  { %s44_s28 = sshll.u32 %s2952_s27, 4  ;;  %p2924_p8 = scmp.ne.s32.totalorder %s3591_s6, %s2923_s11  ;;  %s45_s28 = int_to_ptr.vmem [resolvable:$true] %s44_s28 }
  0x14   :  { %p2927_p9 = scmp.lt.u32.totalorder %s2923_s11, %s3591_s6 }
  0x16   :  { %p2929_p10 = pnand %p2927_p9, %p2924_p8 }
  0x18   :  { %2932 = shalt.err (!%p2929_p10)
}
  0x19   :  { %s2933_s17 = scalar_lea.vmem %s45_s28, 12288  ;;  %p2938_p12 = scmp.lt.s32.totalorder %s45_s28, %s45_s28 }
  0x1a   :  { %p2934_p11 = scmp.ne.s32.totalorder %s45_s28, %s2933_s17  ;;  %p2939_p13 = scmp.lt.s32.totalorder %s2933_s17, %s2933_s17 }
  0x1c   :  { %p2940_p0 = por %p2939_p13, %p2938_p12 }
  0x1e   :  { %p2941_p1 = pnand %p2940_p0, %p2934_p11 }
  0x20   :  { %2944 = shalt.err (!%p2941_p1)
}
  0x21   :  { %s2953_s0 = smov 128   ;;  %s2954_s14 = smov 8  }
  0x22   :  { %50 = dma.hbm_to_vmem [thread:$0]  %s3591_s6, 12288, %s45_s28, [#allocation5], %s2953_s0, %s2953_s0, %s2954_s14  }
  0x23   :  { %2945 = dma.done.wait [#allocation3], 4096  }
  0x24   :  { %2946 = vsyncadd [#allocation3], 4294963200 }
  0x25   :  { %2947 = dma.done.wait [#allocation5], 12288  }
  0x26   :  { %2948 = vsyncadd [#allocation5], 4294955008  ;;  %v2955_v0 = vmov 0   ;;  %v82_v1 = vld [vmem:[%s3586_s1 + $0x8] sm:$0xff]  ;;  %v81_v2 = vld [vmem:[%s3586_s1] sm:$0xff]  ;;  %v2956_v27 = vmov 1  }
  0x27   :  { %2898 = vset.pattern.permute.xlu1 %v2955_v0  ;;  %2896 = vset.pattern.permute.xlu0 %v2955_v0  ;;  %v91_v3 = vadd.f32 1.0, %v82_v1  ;;  %v90_v4 = vadd.f32 1.0, %v81_v2  ;;  %v83_v5 = vld [vmem:[%s3586_s1 + $0x10] sm:$0xf]  ;;  %v66_v8 = vld [vmem:[#allocation2 + $0x8] sm:$0xff]  ;;  %v68_v9 = vld [vmem:[#allocation2 + $0x18] sm:$0xff] }
  0x28   :  { %v92_v10 = vadd.f32 1.0, %v83_v5  ;;  %v2589_v11 = vpack.c.bf16 %v68_v9, %v66_v8  ;;  %v65_v12 = vld [vmem:[#allocation2] sm:$0xff]  ;;  %v67_v13 = vld [vmem:[#allocation2 + $0x10] sm:$0xff]  ;;  %v2122_v16 = vld [vmem:[%s3586_s1 + $0x18] sm:$0xff]  ;;  %v3596_v49 = vmov 0.0   ;;  %v3600_v51 = vmov 0.0|0.0  }
  0x29   :  { %v94_v6 = vmul.f32 0.5, %v91_v3  ;;  %v93_v7 = vmul.f32 0.5, %v90_v4  ;;  %v2591_v17 = vpack.c.bf16 %v67_v13, %v65_v12  ;;  %v70_v18 = vld [vmem:[#allocation2 + $0x28] sm:$0xff]  ;;  %v72_v19 = vld [vmem:[#allocation2 + $0x38] sm:$0xff]  ;;  %v1110_v21 = vadd.f32 1.0, %v2122_v16  ;;  %v69_v23 = vld [vmem:[#allocation2 + $0x20] sm:$0xff]  ;;  %239 = vmatprep.mubr.f32.mxu1 %v3596_v49 }
  0x2a   :  { %2590 = vmatprep.subr.bf16.mxu1 %v2589_v11  ;;  %v95_v20 = vmul.f32 0.5, %v92_v10  ;;  %v2593_v22 = vpack.c.bf16 %v72_v19, %v70_v18  ;;  %v71_v24 = vld [vmem:[#allocation2 + $0x30] sm:$0xff]  ;;  %v2123_v25 = vld [vmem:[%s3586_s1 + $0x20] sm:$0xff]  ;;  %v74_v28 = vld [vmem:[#allocation2 + $0x48] sm:$0xff]  ;;  %vm165_vm0 = vcmask 523264   ;;  %vm2959_vm1 = vmmov 0  }
  0x2b   :  { %v97_v14 = vmul.f32 7.0, %v94_v6  ;;  %v96_v15 = vmul.f32 7.0, %v93_v7  ;;  %2592 = vmatpush1.bf16.msra.mxu1 %v2591_v17  ;;  %v2595_v26 = vpack.c.bf16 %v71_v24, %v69_v23  ;;  %v76_v29 = vld [vmem:[#allocation2 + $0x58] sm:$0xff]  ;;  %v1113_v31 = vmul.f32 0.5, %v1110_v21  ;;  %v73_v34 = vld [vmem:[#allocation2 + $0x40] sm:$0xff]  ;;  %v75_v35 = vld [vmem:[#allocation2 + $0x50] sm:$0xff] }
  0x2c   :  { %2594 = vmatprep.subr.bf16.mxu1 %v2593_v22  ;;  %v98_v30 = vmul.f32 7.0, %v95_v20  ;;  %v1111_v32 = vadd.f32 1.0, %v2123_v25  ;;  %v2597_v33 = vpack.c.bf16 %v76_v29, %v74_v28  ;;  %v2124_v36 = vld [vmem:[%s3586_s1 + $0x28] sm:$0xf]  ;;  %v2599_v37 = vpack.c.bf16 %v75_v35, %v73_v34  ;;  %v80_v39 = vld [vmem:[#allocation2 + $0x78] sm:$0xff]  ;;  %v77_v44 = vld [vmem:[#allocation2 + $0x60] sm:$0xff] }
  0x2d   :  { %106 = vperm.xlu1 %2898, %v97_v14   ;;  %101 = vperm.xlu0 %2896, %v96_v15   ;;  %v78_v38 = vld [vmem:[#allocation2 + $0x68] sm:$0xff]  ;;  %v1116_v40 = vmul.f32 7.0, %v1113_v31  ;;  %v1112_v42 = vadd.f32 1.0, %v2124_v36  ;;  %v79_v45 = vld [vmem:[#allocation2 + $0x70] sm:$0xff]  ;;  %v274_v52 = vld [vmem:[#allocation4 + $0x80] sm:$0xff]  ;;  %vm446_vm2 = vcmask 1042432  }
  0x2e   :  { %v1114_v41 = vmul.f32 0.5, %v1111_v32  ;;  %v2601_v43 = vpack.c.bf16 %v80_v39, %v78_v38  ;;  %v2603_v46 = vpack.c.bf16 %v79_v45, %v77_v44  ;;  %v275_v53 = vld [vmem:[#allocation4 + $0x88] sm:$0xff]  ;;  %v258_v55 = vld [vmem:[#allocation4] sm:$0xff]  ;;  %v276_v58 = vld [vmem:[#allocation4 + $0x90] sm:$0xff]  ;;  %vm442_vm3 = vcmask 23552  }
  0x2f   :  { %2596 = vmatpush1.bf16.msra.mxu1 %v2595_v26  ;;  %v1115_v48 = vmul.f32 0.5, %v1112_v42  ;;  %v3059_v54 = vpack.c.bf16 %v275_v53, %v274_v52  ;;  %v259_v56 = vld [vmem:[#allocation4 + $0x8] sm:$0xff]  ;;  %v277_v59 = vld [vmem:[#allocation4 + $0x98] sm:$0xff]  ;;  %v260_v61 = vld [vmem:[#allocation4 + $0x10] sm:$0xff] }
  0x30   :  { %2598 = vmatprep.subr.bf16.mxu1 %v2597_v33  ;;  %v1117_v47 = vmul.f32 7.0, %v1114_v41  ;;  %v3062_v57 = vpack.c.bf16 %v259_v56, %v258_v55  ;;  %v3065_v60 = vpack.c.bf16 %v277_v59, %v276_v58  ;;  %v261_v62 = vld [vmem:[#allocation4 + $0x18] sm:$0xff]  ;;  %v279_v1 = vld [vmem:[#allocation4 + $0xa8] sm:$0xff]  ;;  %v262_v3 = vld [vmem:[#allocation4 + $0x20] sm:$0xff] }
  0x31   :  { %2899 = vset.pattern.permute.xlu1 %v2956_v27  ;;  %2897 = vset.pattern.permute.xlu0 %v2956_v27  ;;  %v1118_v50 = vmul.f32 7.0, %v1115_v48  ;;  %v3067_v63 = vpack.c.bf16 %v261_v62, %v260_v61  ;;  %v263_v4 = vld [vmem:[#allocation4 + $0x28] sm:$0xff]  ;;  %v280_v6 = vld [vmem:[#allocation4 + $0xb0] sm:$0xff]  ;;  %v281_v7 = vld [vmem:[#allocation4 + $0xb8] sm:$0xff] }
  0x32   :  { %137 = vperm.xlu1 %2899, %v97_v14   ;;  %133 = vperm.xlu0 %2897, %v96_v15   ;;  %v3074_v5 = vpack.c.bf16 %v263_v4, %v262_v3  ;;  %v3076_v8 = vpack.c.bf16 %v281_v7, %v280_v6  ;;  %v264_v9 = vld [vmem:[#allocation4 + $0x30] sm:$0xff]  ;;  %v265_v10 = vld [vmem:[#allocation4 + $0x38] sm:$0xff]  ;;  %v282_v12 = vld [vmem:[#allocation4 + $0xc0] sm:$0xff] }
  0x33   :  { %2600 = vmatpush1.bf16.msra.mxu1 %v2599_v37  ;;  %2618 = vmatprep.subr.bf16.mxu0 %v3059_v54  ;;  %v3080_v11 = vpack.c.bf16 %v265_v10, %v264_v9  ;;  %v283_v13 = vld [vmem:[#allocation4 + $0xc8] sm:$0xff]  ;;  %v266_v15 = vld [vmem:[#allocation4 + $0x40] sm:$0xff]  ;;  %v284_v18 = vld [vmem:[#allocation4 + $0xd0] sm:$0xff] }
  0x34   :  { %2602 = vmatprep.subr.bf16.mxu1 %v2601_v43  ;;  %2620 = vmatpush3.bf16.msra.mxu0 %v3062_v57  ;;  %v3082_v14 = vpack.c.bf16 %v283_v13, %v282_v12  ;;  %v267_v16 = vld [vmem:[#allocation4 + $0x48] sm:$0xff]  ;;  %v285_v19 = vld [vmem:[#allocation4 + $0xd8] sm:$0xff]  ;;  %v268_v21 = vld [vmem:[#allocation4 + $0x50] sm:$0xff] }
  0x35   :  { %2622 = vmatprep.subr.bf16.mxu0 %v3065_v60  ;;  %v3086_v17 = vpack.c.bf16 %v267_v16, %v266_v15  ;;  %v3088_v20 = vpack.c.bf16 %v285_v19, %v284_v18  ;;  %v269_v22 = vld [vmem:[#allocation4 + $0x58] sm:$0xff]  ;;  %v286_v24 = vld [vmem:[#allocation4 + $0xe0] sm:$0xff]  ;;  %v287_v25 = vld [vmem:[#allocation4 + $0xe8] sm:$0xff] }
  0x36   :  { %2900 = vset.pattern.permute.xlu1 %v2955_v0  ;;  %141 = vperm.xlu0 %2897, %v98_v30   ;;  %v278_v0 = vld [vmem:[#allocation4 + $0xa0] sm:$0xff]  ;;  %v3092_v23 = vpack.c.bf16 %v269_v22, %v268_v21  ;;  %v3094_v26 = vpack.c.bf16 %v287_v25, %v286_v24  ;;  %v271_v28 = vld [vmem:[#allocation4 + $0x68] sm:$0xff]  ;;  %v289_v31 = vld [vmem:[#allocation4 + $0xf8] sm:$0xff] }
  0x37   :  { %111 = vperm.xlu1 %2900, %v98_v30   ;;  %2604 = vmatpush1.bf16.msra.mxu1 %v2603_v46  ;;  %v3070_v2 = vpack.c.bf16 %v279_v1, %v278_v0  ;;  %v270_v27 = vld [vmem:[#allocation4 + $0x60] sm:$0xff]  ;;  %v288_v30 = vld [vmem:[#allocation4 + $0xf0] sm:$0xff]  ;;  %v291_v59 = vld [vmem:[%s3592_s7 + $0x8] sm:$0xff] }
  0x38   :  { %2605 = vmatprep.subr.bf16.mxu1 %v3600_v51  ;;  %2624 = vmatpush3.bf16.msra.mxu0 %v3067_v63  ;;  %v3098_v29 = vpack.c.bf16 %v271_v28, %v270_v27  ;;  %v3100_v32 = vpack.c.bf16 %v289_v31, %v288_v30  ;;  %v3107_v33 = vld [vmem:[%s3589_s4] ss:$0 sm:$0xff]  ;;  %v292_v16 = vld [vmem:[%s3592_s7 + $0x10] sm:$0xff]  ;;  %v293_v18 = vld [vmem:[%s3592_s7 + $0x18] sm:$0xff] }
  0x39   :  { %2626 = vmatprep.subr.bf16.mxu0 %v3070_v2  ;;  %v3114_v38 = vld [vmem:[%s3590_s5] ss:$0 sm:$0xff]  ;;  %v3139_v28 = vpack.c.bf16 %v293_v18, %v292_v16  ;;  %v2096_v18 = vld [vmem:[%s3592_s7 + $0x50] sm:$0xff] }
  0x3a   :  { %1147 = vperm.xlu0 %2897, %v1116_v40   ;;  %v290_v58 = vld [vmem:[%s3592_s7] sm:$0xff] }
  0x3b   :  { %1121 = vperm.xlu1 %2900, %v1116_v40   ;;  %v3126_v9 = vpack.c.bf16 %v291_v59, %v290_v58 }
  0x3c   :  { %2628 = vmatpush3.bf16.msra.mxu0 %v3074_v5 }
  0x3d   :  { %2630 = vmatprep.subr.bf16.mxu0 %v3076_v8 }
  0x3e   :  { %1151 = vperm.xlu0 %2897, %v1117_v47  }
  0x3f   :  { %1126 = vperm.xlu1 %2900, %v1117_v47  }
  0x40   :  { %2632 = vmatpush3.bf16.msra.mxu0 %v3080_v11 }
  0x41   :  { %2634 = vmatprep.subr.bf16.mxu0 %v3082_v14 }
  0x42   :  { %1155 = vperm.xlu0 %2897, %v1118_v50  }
  0x43   :  { %1131 = vperm.xlu1 %2900, %v1118_v50  }
  0x44   :  { %2636 = vmatpush3.bf16.msra.mxu0 %v3086_v17 }
  0x45   :  { %2638 = vmatprep.subr.bf16.mxu0 %v3088_v20 }
  0x48   :  { %2640 = vmatpush3.bf16.msra.mxu0 %v3092_v23 }
  0x49   :  { %2642 = vmatprep.subr.bf16.mxu0 %v3094_v26 }
  0x4c   :  { %2644 = vmatpush3.bf16.msra.mxu0 %v3098_v29 }
  0x4d   :  { %2646 = vmatprep.subr.bf16.mxu0 %v3100_v32 }
  0xac   :  { %v102_v34 = vpop.permute.xlu0 %101  ;;  %v107_v35 = vpop.permute.xlu1 %106 }
  0xad   :  { %v120_v36 = vsub.f32 %v102_v34, %v3107_v33  ;;  %v121_v37 = vsub.f32 %v107_v35, %v3107_v33 }
  0xaf   :  { %v123_v39 = vand.u32 2147483647, %v120_v36  ;;  %v124_v40 = vand.u32 2147483647, %v121_v37  ;;  %v294_v37 = vld [vmem:[%s3592_s7 + $0x20] sm:$0xff] }
  0xb1   :  { %v138_v41 = vpop.permute.xlu1 %137  ;;  %v134_v42 = vpop.permute.xlu0 %133  ;;  %v126_v45 = vsub.f32 1.0, %v123_v39  ;;  %v127_v48 = vsub.f32 1.0, %v124_v40  ;;  %v295_v39 = vld [vmem:[%s3592_s7 + $0x28] sm:$0xff] }
  0xb2   :  { %v151_v43 = vsub.f32 %v138_v41, %v3114_v38  ;;  %v150_v44 = vsub.f32 %v134_v42, %v3114_v38 }
  0xb3   :  { %v129_v62 = vmax.f32 %v126_v45, 0.0  ;;  %v130_v3 = vmax.f32 %v127_v48, 0.0 }
  0xb4   :  { %v154_v46 = vand.u32 2147483647, %v151_v43  ;;  %v153_v47 = vand.u32 2147483647, %v150_v44 }
  0xb5   :  { %v142_v50 = vpop.permute.xlu0 %141 }
  0xb6   :  { %v157_v52 = vsub.f32 1.0, %v154_v46  ;;  %v156_v53 = vsub.f32 1.0, %v153_v47  ;;  %v152_v55 = vsub.f32 %v142_v50, %v3114_v38  ;;  %v112_v56 = vpop.permute.xlu1 %111  ;;  %v3153_v47 = vpack.c.bf16 %v295_v39, %v294_v37  ;;  %v532_v39 = vld [vmem:[#allocation4 + $0x100] sm:$0xff] }
  0xb7   :  { %v122_v61 = vsub.f32 %v112_v56, %v3107_v33  ;;  %v297_v56 = vld [vmem:[%s3592_s7 + $0x38] sm:$0xff] }
  0xb8   :  { %v159_v0 = vmax.f32 %v156_v53, 0.0  ;;  %v155_v1 = vand.u32 2147483647, %v152_v55  ;;  %v160_v4 = vmax.f32 %v157_v52, 0.0  ;;  %v296_v55 = vld [vmem:[%s3592_s7 + $0x30] sm:$0xff] }
  0xb9   :  { %v125_v6 = vand.u32 2147483647, %v122_v61  ;;  %v1148_v7 = vpop.permute.xlu0 %1147 }
  0xba   :  { %v162_v10 = vmul.f32 %v159_v0, %v129_v62  ;;  %v158_v12 = vsub.f32 1.0, %v155_v1  ;;  %v1158_v13 = vsub.f32 %v1148_v7, %v3114_v38  ;;  %v1122_v15 = vpop.permute.xlu1 %1121  ;;  %v163_v24 = vmul.f32 %v160_v4, %v130_v3 }
  0xbb   :  { %v128_v19 = vsub.f32 1.0, %v125_v6  ;;  %v1134_v21 = vsub.f32 %v1122_v15, %v3107_v33  ;;  %v3168_v3 = vpack.c.bf16 %v297_v56, %v296_v55  ;;  %v2095_v6 = vld [vmem:[%s3592_s7 + $0x48] sm:$0xff]  ;;  %v84_v15 = vld [vmem:[%s3587_s2] sm:$0xff] }
  0xbc   :  { %v1161_v22 = vand.u32 2147483647, %v1158_v13  ;;  %2087 = vmatmul.mubr.msk.f32.vlgmr.msra.gmra.mrb[0].mxu1 %vm165_vm0, %v162_v10  ;;  %v161_v30 = vmax.f32 %v158_v12, 0.0  ;;  %v536_v56 = vld [vmem:[#allocation4 + $0x120] sm:$0xff] }
  0xbd   :  { %v1137_v25 = vand.u32 2147483647, %v1134_v21  ;;  %v1152_v27 = vpop.permute.xlu0 %1151  ;;  %245 = vmatprep.mubr.f32.mxu1 %v3596_v49  ;;  %2607 = vmatpush3.bf16.msra.mxu1 %v3126_v9  ;;  %v131_v31 = vmax.f32 %v128_v19, 0.0  ;;  %v2097_v19 = vld [vmem:[%s3592_s7 + $0x58] sm:$0xff] }
  0xbe   :  { %v1164_v34 = vsub.f32 1.0, %v1161_v22  ;;  %v1159_v35 = vsub.f32 %v1152_v27, %v3114_v38  ;;  %v1127_v36 = vpop.permute.xlu1 %1126  ;;  %2608 = vmatprep.subr.bf16.mxu1 %v3600_v51  ;;  %v3198_v22 = vpack.c.bf16 %v2097_v19, %v2096_v18  ;;  %v558_v18 = vld [vmem:[#allocation4 + $0x1d0] sm:$0xff]  ;;  %v559_v19 = vld [vmem:[#allocation4 + $0x1d8] sm:$0xff] }
  0xbf   :  { %v1140_v40 = vsub.f32 1.0, %v1137_v25  ;;  %v1135_v41 = vsub.f32 %v1127_v36, %v3107_v33  ;;  %v164_v48 = vmul.f32 %v161_v30, %v131_v31  ;;  %v2099_v25 = vld [vmem:[%s3592_s7 + $0x68] sm:$0xff]  ;;  %v2100_v30 = vld [vmem:[%s3592_s7 + $0x70] sm:$0xff]  ;;  %v2101_v31 = vld [vmem:[%s3592_s7 + $0x78] sm:$0xff] }
  0xc0   :  { %v1167_v42 = vmax.f32 %v1164_v34, 0.0  ;;  %v1162_v43 = vand.u32 2147483647, %v1159_v35  ;;  %2088 = vmatmul.mubr.msk.f32.gmra.mrb[2].mxu1 %vm165_vm0, %v163_v24  ;;  %v2098_v24 = vld [vmem:[%s3592_s7 + $0x60] sm:$0xff]  ;;  %v549_v35 = vld [vmem:[#allocation4 + $0x188] sm:$0xff]  ;;  %v3220_v36 = vpack.c.bf16 %v2101_v31, %v2100_v30  ;;  %v542_v30 = vld [vmem:[#allocation4 + $0x150] sm:$0xff] }
  0xc1   :  { %v1143_v44 = vmax.f32 %v1140_v40, 0.0  ;;  %v1138_v45 = vand.u32 2147483647, %v1135_v41  ;;  %v1156_v46 = vpop.permute.xlu0 %1155  ;;  %251 = vmatprep.mubr.f32.mxu1 %v3596_v49  ;;  %2610 = vmatpush3.bf16.msra.mxu1 %v3139_v28  ;;  %v3210_v27 = vpack.c.bf16 %v2099_v25, %v2098_v24  ;;  %v548_v34 = vld [vmem:[#allocation4 + $0x180] sm:$0xff]  ;;  %v533_v40 = vld [vmem:[#allocation4 + $0x108] sm:$0xff]  ;;  %v550_v41 = vld [vmem:[#allocation4 + $0x190] sm:$0xff]  ;;  %v3257_v25 = vpack.c.bf16 %v559_v19, %v558_v18 }
  0xc2   :  { %v1165_v50 = vsub.f32 1.0, %v1162_v43  ;;  %v1160_v52 = vsub.f32 %v1156_v46, %v3114_v38  ;;  %v1132_v53 = vpop.permute.xlu1 %1131  ;;  %2611 = vmatprep.subr.bf16.mxu1 %v3600_v51  ;;  %v3223_v37 = vpack.c.bf16 %v549_v35, %v548_v34  ;;  %v85_v43 = vld [vmem:[%s3587_s2 + $0x8] sm:$0xff]  ;;  %v534_v46 = vld [vmem:[#allocation4 + $0x110] sm:$0xff]  ;;  %v543_v31 = vld [vmem:[#allocation4 + $0x158] sm:$0xff] }
  0xc3   :  { %v3163_v58 = vmul.f32 %v1167_v42, %v1143_v44  ;;  %v1141_v59 = vsub.f32 1.0, %v1138_v45  ;;  %v1136_v61 = vsub.f32 %v1132_v53, %v3107_v33  ;;  %v2094_v33 = vld [vmem:[%s3592_s7 + $0x40] sm:$0xff]  ;;  %v551_v42 = vld [vmem:[#allocation4 + $0x198] sm:$0xff]  ;;  %v3229_v44 = vpack.c.bf16 %v533_v40, %v532_v39  ;;  %v561_v35 = vld [vmem:[#allocation4 + $0x1e8] sm:$0xff] }
  0xc4   :  { %v1168_v62 = vmax.f32 %v1165_v50, 0.0  ;;  %v1163_v0 = vand.u32 2147483647, %v1160_v52  ;;  %2089 = vmatmul.mubr.msk.f32.gmra.mrb[4].mxu1 %vm165_vm0, %v164_v48  ;;  %v3185_v16 = vpack.c.bf16 %v2095_v6, %v2094_v33  ;;  %v3232_v45 = vpack.c.bf16 %v551_v42, %v550_v41  ;;  %v535_v48 = vld [vmem:[#allocation4 + $0x118] sm:$0xff]  ;;  %v552_v50 = vld [vmem:[#allocation4 + $0x1a0] sm:$0xff]  ;;  %v553_v52 = vld [vmem:[#allocation4 + $0x1a8] sm:$0xff] }
  0xc5   :  { %v1144_v38 = vmax.f32 %v1141_v59, 0.0  ;;  %v1139_v1 = vand.u32 2147483647, %v1136_v61  ;;  %2613 = vmatpush3.bf16.msra.mxu1 %v3153_v47  ;;  %2461 = vmatprep.mubr.msk.f32.mxu1 %vm2959_vm1, %v3596_v49  ;;  %v3236_v53 = vpack.c.bf16 %v535_v48, %v534_v46  ;;  %v3239_v55 = vpack.c.bf16 %v553_v52, %v552_v50  ;;  %v537_v59 = vld [vmem:[#allocation4 + $0x128] sm:$0xff]  ;;  %v554_v61 = vld [vmem:[#allocation4 + $0x1b0] sm:$0xff]  ;;  %v556_v33 = vld [vmem:[#allocation4 + $0x1c0] sm:$0xff] }
  0xc6   :  { %v1166_v4 = vsub.f32 1.0, %v1163_v0  ;;  %2614 = vmatprep.subr.bf16.mxu1 %v3600_v51  ;;  %v3242_v0 = vpack.c.bf16 %v537_v59, %v536_v56  ;;  %v557_v6 = vld [vmem:[#allocation4 + $0x1c8] sm:$0xff]  ;;  %v560_v34 = vld [vmem:[#allocation4 + $0x1e0] sm:$0xff]  ;;  %v3260_v39 = vpack.c.bf16 %v543_v31, %v542_v30  ;;  %v272_v46 = vld [vmem:[#allocation4 + $0x70] sm:$0xff] }
  0xc7   :  { %v3179_v7 = vmul.f32 %v1168_v62, %v1144_v38  ;;  %v1142_v10 = vsub.f32 1.0, %v1139_v1  ;;  %v555_v62 = vld [vmem:[#allocation4 + $0x1b8] sm:$0xff]  ;;  %v538_v1 = vld [vmem:[#allocation4 + $0x130] sm:$0xff]  ;;  %v3263_v40 = vpack.c.bf16 %v561_v35, %v560_v34  ;;  %v544_v41 = vld [vmem:[#allocation4 + $0x160] sm:$0xff] }
  0xc8   :  { %v1169_v12 = vmax.f32 %v1166_v4, 0.0  ;;  %v3245_v38 = vpack.c.bf16 %v555_v62, %v554_v61  ;;  %v539_v4 = vld [vmem:[#allocation4 + $0x138] sm:$0xff]  ;;  %v545_v42 = vld [vmem:[#allocation4 + $0x168] sm:$0xff]  ;;  %v562_v52 = vld [vmem:[#allocation4 + $0x1f0] sm:$0xff] }
  0xc9   :  { %v1145_v13 = vmax.f32 %v1142_v10, 0.0  ;;  %2616 = vmatpush3.bf16.msra.mxu1 %v3168_v3  ;;  %v3248_v10 = vpack.c.bf16 %v539_v4, %v538_v1  ;;  %v273_v48 = vld [vmem:[#allocation4 + $0x78] sm:$0xff]  ;;  %v546_v61 = vld [vmem:[#allocation4 + $0x170] sm:$0xff]  ;;  %v2117_v30 = vld [vmem:[%s3593_s8 + $0x8] sm:$0x7] }
  0xca   :  { %2649 = vmatprep.subr.bf16.mxu1 %v3600_v51  ;;  %v3270_v50 = vpack.c.bf16 %v273_v48, %v272_v46  ;;  %v563_v56 = vld [vmem:[#allocation4 + $0x1f8] sm:$0xff]  ;;  %v2103_v31 = vld [vmem:[%s3593_s8 + $0x4] sm:$0x7]  ;;  %v1084_v46 = vld [vmem:[#allocation2 + $0x90] sm:$0xff] }
  0xcb   :  { %v3194_v21 = vmul.f32 %v1169_v12, %v1145_v13  ;;  %v3251_v12 = vpack.c.bf16 %v557_v6, %v556_v33  ;;  %v540_v13 = vld [vmem:[#allocation4 + $0x140] sm:$0xff]  ;;  %v3273_v59 = vpack.c.bf16 %v563_v56, %v562_v52  ;;  %v547_v62 = vld [vmem:[#allocation4 + $0x178] sm:$0xff]  ;;  %v1087_v52 = vld [vmem:[#allocation2 + $0xa8] sm:$0xff] }
  0xcc   :  { %2462 = vmatmul.mubr.msk.f32.vlgmr.msra.gmra.mrb[6].mxu1 %vm165_vm0, %v84_v15  ;;  %v541_v15 = vld [vmem:[#allocation4 + $0x148] sm:$0xff]  ;;  %2648 = vmatpush3.bf16.msra.mxu0 %v3270_v50  ;;  %v3276_v1 = vpack.c.bf16 %v547_v62, %v546_v61  ;;  %v441_v6 = vld [vmem:[%s3593_s8] sm:$0x7]  ;;  %v1085_v18 = vld [vmem:[#allocation2 + $0x98] sm:$0xff] }
  0xcd   :  { %2651 = vmatpush3.bf16.msra.mxu1 %v3185_v16  ;;  %2485 = vmatprep.mubr.msk.f32.mxu1 %vm2959_vm1, %v3596_v49  ;;  %v3254_v24 = vpack.c.bf16 %v541_v15, %v540_v13  ;;  %v87_v13 = vld [vmem:[%s3588_s3] sm:$0xff]  ;;  %v1083_v15 = vld [vmem:[#allocation2 + $0x88] sm:$0xff]  ;;  %v1089_v56 = vld [vmem:[#allocation2 + $0xb8] sm:$0xff] }
  0xce   :  { %2652 = vmatprep.subr.bf16.mxu1 %v3600_v51  ;;  %2464 = vmatprep.subr.mxu0 %v3596_v49  ;;  %v2108_v34 = vld [vmem:[%s3592_s7 + $0x80] sm:$0xff]  ;;  %v2737_v48 = vpack.c.bf16 %v1085_v18, %v1083_v15  ;;  %v88_v62 = vld [vmem:[%s3588_s3 + $0x8] sm:$0xff]  ;;  %v2741_v18 = vpack.c.bf16 %v1089_v56, %v1087_v52 }
  0xcf   :  { %v2113_v52 = vld [vmem:[%s3592_s7 + $0xa8] sm:$0xff]  ;;  %v1090_v56 = vld [vmem:[#allocation2 + $0xc0] sm:$0xff] }
  0xd1   :  { %2654 = vmatpush3.bf16.msra.mxu1 %v3198_v22 }
  0xd2   :  { %2655 = vmatprep.subr.bf16.mxu1 %v3600_v51 }
  0xd5   :  { %2657 = vmatpush3.bf16.msra.mxu1 %v3210_v27 }
  0xd6   :  { %2658 = vmatprep.subr.bf16.mxu1 %v3600_v51 }
  0xd9   :  { %2660 = vmatpush3.bf16.msra.mxu1 %v3220_v36 }
  0xda   :  { %2662 = vmatprep.subr.bf16.mxu1 %v3223_v37 }
  0xdc   :  { %2486 = vmatmul.mubr.msk.f32.vlgmr.msra.gmra.mrb[8].mxu1 %vm165_vm0, %v85_v43  ;;  %v3266_v43 = vpack.c.bf16 %v545_v42, %v544_v41  ;;  %v2109_v41 = vld [vmem:[%s3592_s7 + $0x88] sm:$0xff]  ;;  %v1082_v42 = vld [vmem:[#allocation2 + $0x80] sm:$0xff] }
  0xdd   :  { %2664 = vmatpush3.bf16.msra.mxu1 %v3229_v44 }
  0xde   :  { %2666 = vmatprep.subr.bf16.mxu1 %v3232_v45 }
  0xe1   :  { %2668 = vmatpush3.bf16.msra.mxu1 %v3236_v53 }
  0xe2   :  { %2670 = vmatprep.subr.bf16.mxu1 %v3239_v55 }
  0xe5   :  { %2672 = vmatpush3.bf16.msra.mxu1 %v3242_v0 }
  0xe6   :  { %2674 = vmatprep.subr.bf16.mxu1 %v3245_v38 }
  0xe9   :  { %2676 = vmatpush3.bf16.msra.mxu1 %v3248_v10 }
  0xea   :  { %2678 = vmatprep.subr.bf16.mxu1 %v3251_v12 }
  0xed   :  { %2680 = vmatpush3.bf16.msra.mxu1 %v3254_v24 }
  0xee   :  { %2682 = vmatprep.subr.bf16.mxu1 %v3257_v25 }
  0xf1   :  { %2684 = vmatpush3.bf16.msra.mxu1 %v3260_v39 }
  0xf2   :  { %2686 = vmatprep.subr.bf16.mxu1 %v3263_v40 }
  0xf5   :  { %2688 = vmatpush3.bf16.msra.mxu1 %v3266_v43 }
  0xf6   :  { %2690 = vmatprep.subr.bf16.mxu1 %v3273_v59 }
  0xf9   :  { %2692 = vmatpush3.bf16.msra.mxu1 %v3276_v1 }
  0xfa   :  { %2512 = vmatprep.subr.mxu1 %v3596_v49 }
 0x18f   :  { %v241_v4 = vpop.f32.mrb[0].mxu1 }
 0x190   :  { %v243_v33 = vpop.f32.mrb[1].mxu1 }
 0x191   :  { %435 = vmatprep.mubr.f32.mxu0 %v243_v33  ;;  %v89_v33 = vld [vmem:[%s3588_s3 + $0x10] sm:$0xf] }
 0x192   :  { %436 = vmatmul.mubr.f32.vlgmr.msra.gmra.mrb[0].mxu0 %v241_v4  ;;  %v3311_v4 = vpack.c.bf16 %v2109_v41, %v2108_v34  ;;  %v1091_v34 = vld [vmem:[#allocation2 + $0xc8] sm:$0xff] }
 0x193   :  { %v247_v19 = vpop.f32.mrb[2].mxu1  ;;  %2465 = vmatpush3.msk.msra.mxu0 %vm446_vm2, %v441_v6  ;;  %2466 = vmatprep.mubr.msk.f32.mxu0 %vm2959_vm1, %v3596_v49  ;;  %v2739_v6 = vpack.c.bf16 %v1084_v46, %v1082_v42  ;;  %v2112_v46 = vld [vmem:[%s3592_s7 + $0xa0] sm:$0xff] }
 0x194   :  { %v249_v35 = vpop.f32.mrb[3].mxu1  ;;  %2488 = vmatprep.subr.mxu0 %v3596_v49  ;;  %3603 = vst [vmem:[#allocation8_spill] sm:$0xff] %v3311_v4 }
 0x195   :  { %710 = vmatprep.mubr.f32.mxu1 %v249_v35  ;;  %v1093_v35 = vld [vmem:[#allocation2 + $0xd8] sm:$0xff] }
 0x196   :  { %2467 = vmatmul.mubr.msk.f32.vlgmr.msra.gmra.mrb[2].mxu0 %vm442_vm3, %v87_v13  ;;  %711 = vmatmul.mubr.f32.vlgmr.msra.gmra.mrb[10].mxu1 %v247_v19  ;;  %v2110_v13 = vld [vmem:[%s3592_s7 + $0x90] sm:$0xff]  ;;  %v2111_v19 = vld [vmem:[%s3592_s7 + $0x98] sm:$0xff] }
 0x197   :  { %2513 = vmatpush3.msk.msra.mxu1 %vm446_vm2, %v2117_v30  ;;  %v3305_v61 = vpop.f32.mrb[4].mxu1  ;;  %2489 = vmatpush3.msk.msra.mxu0 %vm446_vm2, %v2103_v31  ;;  %v1086_v30 = vld [vmem:[#allocation2 + $0xa0] sm:$0xff]  ;;  %v1088_v31 = vld [vmem:[#allocation2 + $0xb0] sm:$0xff]  ;;  %v3332_v41 = vpack.c.bf16 %v2111_v19, %v2110_v13  ;;  %v3345_v13 = vpack.c.bf16 %v2113_v52, %v2112_v46  ;;  %v824_v52 = vld [vmem:[#allocation4 + $0x288] sm:$0xff] }
 0x198   :  { %v3319_v15 = vpop.f32.mrb[5].mxu1  ;;  %2490 = vmatprep.mubr.msk.f32.mxu0 %vm2959_vm1, %v3596_v49  ;;  %2693 = vmatprep.subr.bf16.mxu0 %v3600_v51  ;;  %v2743_v42 = vpack.c.bf16 %v1088_v31, %v1086_v30  ;;  %v2114_v19 = vld [vmem:[%s3592_s7 + $0xb0] sm:$0xff]  ;;  %v823_v46 = vld [vmem:[#allocation4 + $0x280] sm:$0xff] }
 0x199   :  { %2514 = vmatprep.mubr.msk.f32.mxu1 %vm2959_vm1, %v3596_v49  ;;  %2738 = vmatprep.subr.bf16.mxu1 %v2737_v48  ;;  %3604 = vst [vmem:[#allocation9_spill] sm:$0xff] %v3332_v41  ;;  %v2745_v48 = vpack.c.bf16 %v1093_v35, %v1091_v34  ;;  %v1097_v49 = vld [vmem:[#allocation2 + $0xf8] sm:$0xff]  ;;  %v1094_v35 = vld [vmem:[#allocation2 + $0xe0] sm:$0xff] }
 0x19a   :  { %2491 = vmatmul.mubr.msk.f32.vlgmr.msra.gmra.mrb[4].mxu0 %vm442_vm3, %v88_v62  ;;  %2515 = vmatmul.mubr.msk.f32.vlgmr.msra.gmra.mrb[12].mxu1 %vm442_vm3, %v89_v33  ;;  %v1092_v62 = vld [vmem:[#allocation2 + $0xd0] sm:$0xff]  ;;  %v1095_v33 = vld [vmem:[#allocation2 + $0xe8] sm:$0xff]  ;;  %v2115_v34 = vld [vmem:[%s3592_s7 + $0xb8] sm:$0xff] }
 0x19b   :  { %2695 = vmatpush3.bf16.msra.mxu0 %v3311_v4  ;;  %2740 = vmatpush1.bf16.msra.mxu1 %v2739_v6  ;;  %v3605_v6 = vmov 0.0   ;;  %v2749_v31 = vpack.c.bf16 %v1097_v49, %v1095_v33  ;;  %v807_v49 = vld [vmem:[#allocation4 + $0x200] sm:$0xff]  ;;  %v808_v33 = vld [vmem:[#allocation4 + $0x208] sm:$0xff]  ;;  %v825_v4 = vld [vmem:[#allocation4 + $0x290] sm:$0xff] }
 0x19c   :  { %2696 = vmatprep.subr.bf16.mxu0 %v3600_v51  ;;  %2742 = vmatprep.subr.bf16.mxu1 %v2741_v18  ;;  %v2747_v18 = vpack.c.bf16 %v1092_v62, %v1090_v56  ;;  %v3357_v56 = vpack.c.bf16 %v2115_v34, %v2114_v19  ;;  %v809_v19 = vld [vmem:[#allocation4 + $0x210] sm:$0xff]  ;;  %v827_v34 = vld [vmem:[#allocation4 + $0x2a0] sm:$0xff] }
 0x19d   :  { %2509 = vmatprep.mubr.msk.f32.mxu0 %vm2959_vm1, %v3605_v6  ;;  %1246 = vmatprep.mubr.f32.mxu1 %v3605_v6 }
 0x19f   :  { %2698 = vmatpush3.bf16.msra.mxu0 %v3332_v41  ;;  %2744 = vmatpush1.bf16.msra.mxu1 %v2743_v42  ;;  %v3350_v30 = vpop.f32.mrb[6].mxu1  ;;  %v1096_v41 = vld [vmem:[#allocation2 + $0xf0] sm:$0xff] }
 0x1a0   :  { %3606 = vst [vmem:[#allocation10_spill] sm:$0xff] %v3350_v30  ;;  %2699 = vmatprep.subr.bf16.mxu0 %v3600_v51  ;;  %2746 = vmatprep.subr.bf16.mxu1 %v2745_v48  ;;  %v2463_v42 = vpop.f32.mrb[7].mxu1  ;;  %v2751_v62 = vpack.c.bf16 %v1096_v41, %v1094_v35  ;;  %v3360_v48 = vpack.c.bf16 %v824_v52, %v823_v46  ;;  %v826_v30 = vld [vmem:[#allocation4 + $0x298] sm:$0xff]  ;;  %v828_v35 = vld [vmem:[#allocation4 + $0x2a8] sm:$0xff] }
 0x1a1   :  { %v86_v42 = vld [vmem:[%s3587_s2 + $0x10] sm:$0xf]  ;;  %v3369_v41 = vpack.c.bf16 %v826_v30, %v825_v4  ;;  %v3381_v4 = vpack.c.bf16 %v828_v35, %v827_v34  ;;  %v811_v30 = vld [vmem:[#allocation4 + $0x220] sm:$0xff]  ;;  %v812_v52 = vld [vmem:[#allocation4 + $0x228] sm:$0xff] }
 0x1a2   :  { %v832_v34 = vld [vmem:[#allocation4 + $0x2c8] sm:$0xff] }
 0x1a3   :  { %2701 = vmatpush3.bf16.msra.mxu0 %v3345_v13  ;;  %2748 = vmatpush1.bf16.msra.mxu1 %v2747_v18  ;;  %v3366_v18 = vpack.c.bf16 %v808_v33, %v807_v49  ;;  %v830_v49 = vld [vmem:[#allocation4 + $0x2b8] sm:$0xff] }
 0x1a4   :  { %2702 = vmatprep.subr.bf16.mxu0 %v3600_v51  ;;  %2750 = vmatprep.subr.bf16.mxu1 %v2749_v31  ;;  %v810_v31 = vld [vmem:[#allocation4 + $0x218] sm:$0xff] }
 0x1a5   :  { %v3377_v46 = vpack.c.bf16 %v810_v31, %v809_v19  ;;  %v814_v19 = vld [vmem:[#allocation4 + $0x238] sm:$0xff]  ;;  %v831_v31 = vld [vmem:[#allocation4 + $0x2c0] sm:$0xff] }
 0x1a6   :  { %v3406_v35 = vpack.c.bf16 %v832_v34, %v831_v31  ;;  %v836_v31 = vld [vmem:[#allocation4 + $0x2e8] sm:$0xff]  ;;  %v1448_v34 = vld [vmem:[%s3593_s8] sm:$0x7] }
 0x1a7   :  { %2704 = vmatpush3.bf16.msra.mxu0 %v3357_v56  ;;  %2752 = vmatpush1.bf16.msra.mxu1 %v2751_v62  ;;  %v829_v62 = vld [vmem:[#allocation4 + $0x2b0] sm:$0xff] }
 0x1a8   :  { %2706 = vmatprep.subr.bf16.mxu0 %v3360_v48  ;;  %2753 = vmatprep.subr.bf16.mxu1 %v3600_v51  ;;  %v3394_v33 = vpack.c.bf16 %v830_v49, %v829_v62  ;;  %v833_v62 = vld [vmem:[#allocation4 + $0x2d0] sm:$0xff] }
 0x1aa   :  { %2510 = vmatmul.mubr.msk.f32.vlgmr.msra.gmra.mrb[6].mxu0 %vm165_vm0, %v86_v42  ;;  %2131 = vmatmul.mubr.msk.f32.vlgmr.msra.gmra.mrb[14].mxu1 %vm165_vm0, %v3163_v58  ;;  %v3389_v58 = vpack.c.bf16 %v812_v52, %v811_v30  ;;  %v813_v42 = vld [vmem:[#allocation4 + $0x230] sm:$0xff]  ;;  %v815_v30 = vld [vmem:[#allocation4 + $0x240] sm:$0xff]  ;;  %v816_v52 = vld [vmem:[#allocation4 + $0x248] sm:$0xff] }
 0x1ab   :  { %2708 = vmatpush3.bf16.msra.mxu0 %v3366_v18  ;;  %985 = vmatprep.mubr.f32.mxu0 %v3319_v15 }
 0x1ac   :  { %1252 = vmatprep.mubr.f32.mxu1 %v3605_v6  ;;  %2710 = vmatprep.subr.bf16.mxu0 %v3369_v41 }
 0x1ad   :  { %2755 = vmatpush3.bf16.msra.mxu1 %v3126_v9 }
 0x1ae   :  { %2132 = vmatmul.mubr.msk.f32.gmra.mrb[16].mxu1 %vm165_vm0, %v3179_v7  ;;  %2756 = vmatprep.subr.bf16.mxu1 %v3600_v51  ;;  %v3401_v7 = vpack.c.bf16 %v814_v19, %v813_v42  ;;  %v817_v42 = vld [vmem:[#allocation4 + $0x250] sm:$0xff]  ;;  %v818_v19 = vld [vmem:[#allocation4 + $0x258] sm:$0xff] }
 0x1af   :  { %2712 = vmatpush3.bf16.msra.mxu0 %v3377_v46  ;;  %1258 = vmatprep.mubr.f32.mxu1 %v3605_v6  ;;  %v3391_v15 = vpop.f32.mrb[8].mxu1 }
 0x1b0   :  { %2714 = vmatprep.subr.bf16.mxu0 %v3381_v4  ;;  %v2487_v9 = vpop.f32.mrb[9].mxu1 }
 0x1b1   :  { %2758 = vmatpush3.bf16.msra.mxu1 %v3139_v28  ;;  %v834_v28 = vld [vmem:[#allocation4 + $0x2d8] sm:$0xff]  ;;  %v835_v9 = vld [vmem:[#allocation4 + $0x2e0] sm:$0xff] }
 0x1b2   :  { %2133 = vmatmul.mubr.msk.f32.gmra.mrb[18].mxu1 %vm165_vm0, %v3194_v21  ;;  %2759 = vmatprep.subr.bf16.mxu1 %v3600_v51  ;;  %v3411_v21 = vpack.c.bf16 %v816_v52, %v815_v30  ;;  %v3414_v49 = vpack.c.bf16 %v834_v28, %v833_v62  ;;  %v3425_v30 = vpack.c.bf16 %v818_v19, %v817_v42  ;;  %v819_v62 = vld [vmem:[#allocation4 + $0x260] sm:$0xff]  ;;  %v837_v28 = vld [vmem:[#allocation4 + $0x2f0] sm:$0xff]  ;;  %v2128_v42 = vld [vmem:[%s3588_s3 + $0x18] sm:$0xff]  ;;  %v3608_v19 = vmov 0.0|0.0  }
 0x1b3   :  { %2716 = vmatpush3.bf16.msra.mxu0 %v3389_v58  ;;  %2533 = vmatprep.mubr.msk.f32.mxu1 %vm2959_vm1, %v3605_v6  ;;  %v3428_v52 = vpack.c.bf16 %v836_v31, %v835_v9 }
 0x1b4   :  { %2718 = vmatprep.subr.bf16.mxu0 %v3394_v33  ;;  %3607 = vst [vmem:[#allocation11_spill] sm:$0xff] %v3414_v49 }
 0x1b5   :  { %2761 = vmatpush3.bf16.msra.mxu1 %v3153_v47  ;;  %v2125_v47 = vld [vmem:[%s3587_s2 + $0x18] sm:$0xff] }
 0x1b6   :  { %2762 = vmatprep.subr.bf16.mxu1 %v3600_v51  ;;  %v838_v51 = vld [vmem:[#allocation4 + $0x2f8] sm:$0xff] }
 0x1b7   :  { %2720 = vmatpush3.bf16.msra.mxu0 %v3401_v7  ;;  %v3442_v31 = vpack.c.bf16 %v838_v51, %v837_v28  ;;  %v2126_v51 = vld [vmem:[%s3587_s2 + $0x20] sm:$0xff] }
 0x1b8   :  { %2722 = vmatprep.subr.bf16.mxu0 %v3406_v35 }
 0x1b9   :  { %2764 = vmatpush3.bf16.msra.mxu1 %v3168_v3  ;;  %v820_v3 = vld [vmem:[#allocation4 + $0x268] sm:$0xff] }
 0x1ba   :  { %2536 = vmatprep.subr.mxu1 %v3605_v6  ;;  %v3439_v9 = vpack.c.bf16 %v820_v3, %v819_v62  ;;  %v2127_v62 = vld [vmem:[%s3587_s2 + $0x28] sm:$0xf] }
 0x1bb   :  { %2724 = vmatpush3.bf16.msra.mxu0 %v3411_v21 }
 0x1bc   :  { %2726 = vmatprep.subr.bf16.mxu0 %v3414_v49  ;;  %2534 = vmatmul.mubr.msk.f32.vlgmr.msra.gmra.mrb[20].mxu1 %vm165_vm0, %v2125_v47  ;;  %v821_v47 = vld [vmem:[#allocation4 + $0x270] sm:$0xff]  ;;  %v822_v49 = vld [vmem:[#allocation4 + $0x278] sm:$0xff] }
 0x1bd   :  { %2537 = vmatpush3.msk.msra.mxu1 %vm446_vm2, %v1448_v34  ;;  %2538 = vmatprep.mubr.msk.f32.mxu1 %vm2959_vm1, %v3605_v6  ;;  %v3450_v34 = vpack.c.bf16 %v822_v49, %v821_v47 }
 0x1be   :  { %2797 = vmatprep.subr.bf16.mxu1 %v3608_v19 }
 0x1bf   :  { %2728 = vmatpush3.bf16.msra.mxu0 %v3425_v30 }
 0x1c0   :  { %2730 = vmatprep.subr.bf16.mxu0 %v3428_v52  ;;  %2539 = vmatmul.mubr.msk.f32.vlgmr.msra.gmra.mrb[22].mxu1 %vm442_vm3, %v2128_v42 }
 0x1c1   :  { %2799 = vmatpush3.bf16.msra.mxu1 %v3185_v16  ;;  %2557 = vmatprep.mubr.msk.f32.mxu1 %vm2959_vm1, %v3605_v6 }
 0x1c2   :  { %2800 = vmatprep.subr.bf16.mxu1 %v3608_v19 }
 0x1c3   :  { %2732 = vmatpush3.bf16.msra.mxu0 %v3439_v9 }
 0x1c4   :  { %2734 = vmatprep.subr.bf16.mxu0 %v3442_v31 }
 0x1c5   :  { %2802 = vmatpush3.bf16.msra.mxu1 %v3198_v22  ;;  %v3509_v22 = vld [vmem:[%s3594_s9 + $0x1] ss:$0 sm:$0xff] }
 0x1c6   :  { %2803 = vmatprep.subr.bf16.mxu1 %v3608_v19 }
 0x1c7   :  { %2736 = vmatpush3.bf16.msra.mxu0 %v3450_v34 }
 0x1c8   :  { %2766 = vmatprep.subr.bf16.mxu0 %v3059_v54 }
 0x1c9   :  { %2805 = vmatpush3.bf16.msra.mxu1 %v3210_v27 }
 0x1ca   :  { %986 = vmatmul.mubr.f32.vlgmr.msra.gmra.mrb[8].mxu0 %v3305_v61  ;;  %2806 = vmatprep.subr.bf16.mxu1 %v3608_v19  ;;  %v3611_v61 = vld [vmem:[#allocation9_spill] sm:$0xff] }
 0x1cb   :  { %2768 = vmatpush3.bf16.msra.mxu0 %v3062_v57 }
 0x1cc   :  { %2770 = vmatprep.subr.bf16.mxu0 %v3065_v60 }
 0x1cd   :  { %2808 = vmatpush3.bf16.msra.mxu1 %v3220_v36 }
 0x1ce   :  { %2810 = vmatprep.subr.bf16.mxu1 %v3223_v37 }
 0x1cf   :  { %2772 = vmatpush3.bf16.msra.mxu0 %v3067_v63 }
 0x1d0   :  { %2558 = vmatmul.mubr.msk.f32.vlgmr.msra.gmra.mrb[24].mxu1 %vm165_vm0, %v2126_v51  ;;  %2774 = vmatprep.subr.bf16.mxu0 %v3070_v2  ;;  %v3609_v2 = vld [vmem:[#allocation10_spill] sm:$0xff] }
 0x1d1   :  { %2812 = vmatpush3.bf16.msra.mxu1 %v3229_v44 }
 0x1d2   :  { %2814 = vmatprep.subr.bf16.mxu1 %v3232_v45 }
 0x1d3   :  { %2776 = vmatpush3.bf16.msra.mxu0 %v3074_v5 }
 0x1d4   :  { %2778 = vmatprep.subr.bf16.mxu0 %v3076_v8 }
 0x1d5   :  { %2816 = vmatpush3.bf16.msra.mxu1 %v3236_v53 }
 0x1d6   :  { %2818 = vmatprep.subr.bf16.mxu1 %v3239_v55 }
 0x1d7   :  { %2780 = vmatpush3.bf16.msra.mxu0 %v3080_v11  ;;  %v3502_v11 = vld [vmem:[%s3594_s9] ss:$0 sm:$0xff] }
 0x1d8   :  { %2782 = vmatprep.subr.bf16.mxu0 %v3082_v14 }
 0x1d9   :  { %2820 = vmatpush3.bf16.msra.mxu1 %v3242_v0 }
 0x1da   :  { %2822 = vmatprep.subr.bf16.mxu1 %v3245_v38 }
 0x1db   :  { %2784 = vmatpush3.bf16.msra.mxu0 %v3086_v17 }
 0x1dc   :  { %2786 = vmatprep.subr.bf16.mxu0 %v3088_v20 }
 0x1dd   :  { %2824 = vmatpush3.bf16.msra.mxu1 %v3248_v10  ;;  %v2148_v10 = vld [vmem:[%s3593_s8 + $0x4] sm:$0x7] }
 0x1de   :  { %2826 = vmatprep.subr.bf16.mxu1 %v3251_v12 }
 0x1df   :  { %2788 = vmatpush3.bf16.msra.mxu0 %v3092_v23 }
 0x1e0   :  { %2790 = vmatprep.subr.bf16.mxu0 %v3094_v26 }
 0x1e1   :  { %2828 = vmatpush3.bf16.msra.mxu1 %v3254_v24 }
 0x1e2   :  { %2830 = vmatprep.subr.bf16.mxu1 %v3257_v25  ;;  %v2129_v25 = vld [vmem:[%s3588_s3 + $0x20] sm:$0xff] }
 0x1e3   :  { %2792 = vmatpush3.bf16.msra.mxu0 %v3098_v29 }
 0x1e4   :  { %2794 = vmatprep.subr.bf16.mxu0 %v3100_v32 }
 0x1e5   :  { %2832 = vmatpush3.bf16.msra.mxu1 %v3260_v39 }
 0x1e6   :  { %2834 = vmatprep.subr.bf16.mxu1 %v3263_v40  ;;  %v2163_v40 = vld [vmem:[%s3593_s8 + $0x8] sm:$0x7] }
 0x1e7   :  { %2796 = vmatpush3.bf16.msra.mxu0 %v3270_v50 }
 0x1e8   :  { %2560 = vmatprep.subr.mxu0 %v3605_v6 }
 0x1e9   :  { %2836 = vmatpush3.bf16.msra.mxu1 %v3266_v43  ;;  %v3610_v43 = vld [vmem:[#allocation8_spill] sm:$0xff] }
 0x1ea   :  { %2838 = vmatprep.subr.bf16.mxu1 %v3273_v59  ;;  %v2130_v59 = vld [vmem:[%s3588_s3 + $0x28] sm:$0xf] }
 0x1ed   :  { %2840 = vmatpush3.bf16.msra.mxu1 %v3276_v1 }
 0x1ee   :  { %2584 = vmatprep.subr.mxu1 %v3605_v6 }
 0x265   :  { %v2210_v54 = vpop.f32.mrb[0].mxu0 }
 0x266   :  { %v2211_v57 = vpop.f32.mrb[1].mxu0 }
 0x267   :  { %v2212_v60 = vadd.f32 %v2211_v57, %v2210_v54 }
 0x269   :  { %v2256_v63 = vpop.f32.mrb[10].mxu1  ;;  %v438_v5 = vadd.f32 %v2212_v60, %v3609_v2  ;;  %v516_v8 = vpop.f32.mrb[2].mxu0 }
 0x26a   :  { %v2257_v14 = vpop.f32.mrb[11].mxu1  ;;  %v2468_v17 = vpop.f32.mrb[3].mxu0 }
 0x26b   :  { %v520_v20 = vadd.f32 %v516_v8, %v438_v5  ;;  %v2258_v23 = vadd.f32 %v2257_v14, %v2256_v63 }
 0x26d   :  { %v528_v26 = vadd.f32 %v3502_v11, %v520_v20  ;;  %v1065_v29 = vpop.f32.mrb[12].mxu1  ;;  %v713_v32 = vadd.f32 %v2258_v23, %v3391_v15  ;;  %v790_v16 = vpop.f32.mrb[4].mxu0 }
 0x26e   :  { %v2516_v27 = vpop.f32.mrb[13].mxu1  ;;  %v2492_v36 = vpop.f32.mrb[5].mxu0 }
 0x26f   :  { %v529_v37 = vmax.f32 %v528_v26, 0.0  ;;  %v794_v44 = vadd.f32 %v790_v16, %v713_v32 }
 0x271   :  { %530 = vst [vmem:[%s3595_s10] sm:$0xff] %v529_v37  ;;  %v803_v45 = vadd.f32 %v3509_v22, %v794_v44 }
 0x273   :  { %v804_v53 = vmax.f32 %v803_v45, 0.0 }
 0x275   :  { %805 = vst [vmem:[%s3595_s10 + $0x8] sm:$0xff] %v804_v53 }
 0x27d   :  { %v1248_v55 = vpop.f32.mrb[14].mxu1  ;;  %v917_v0 = vpop.f32.mrb[6].mxu0 }
 0x27e   :  { %v1250_v38 = vpop.f32.mrb[15].mxu1  ;;  %v2511_v12 = vpop.f32.mrb[7].mxu0 }
 0x27f   :  { %1442 = vmatprep.mubr.f32.mxu0 %v1250_v38 }
 0x280   :  { %1443 = vmatmul.mubr.f32.vlgmr.msra.gmra.mrb[10].mxu0 %v1248_v55 }
 0x281   :  { %2561 = vmatpush3.msk.msra.mxu0 %vm446_vm2, %v2148_v10  ;;  %v1254_v24 = vpop.f32.mrb[16].mxu1  ;;  %2562 = vmatprep.mubr.msk.f32.mxu0 %vm2959_vm1, %v3605_v6 }
 0x282   :  { %v1256_v39 = vpop.f32.mrb[17].mxu1  ;;  %2841 = vmatprep.subr.bf16.mxu0 %v3608_v19 }
 0x283   :  { %1714 = vmatprep.mubr.f32.mxu1 %v1256_v39 }
 0x284   :  { %1715 = vmatmul.mubr.f32.vlgmr.msra.gmra.mrb[26].mxu1 %v1254_v24  ;;  %2563 = vmatmul.mubr.msk.f32.vlgmr.msra.gmra.mrb[12].mxu0 %vm442_vm3, %v2129_v25 }
 0x285   :  { %2843 = vmatpush3.bf16.msra.mxu0 %v3610_v43  ;;  %v1260_v50 = vpop.f32.mrb[18].mxu1  ;;  %2581 = vmatprep.mubr.msk.f32.mxu0 %vm2959_vm1, %v3605_v6 }
 0x286   :  { %v1262_v1 = vpop.f32.mrb[19].mxu1  ;;  %2844 = vmatprep.subr.bf16.mxu0 %v3608_v19  ;;  %2585 = vmatpush3.msk.msra.mxu1 %vm446_vm2, %v2163_v40 }
 0x287   :  { %2586 = vmatprep.mubr.msk.f32.mxu1 %vm2959_vm1, %v3605_v6 }
 0x288   :  { %2587 = vmatmul.mubr.msk.f32.vlgmr.msra.gmra.mrb[28].mxu1 %vm442_vm3, %v2130_v59 }
 0x289   :  { %2846 = vmatpush3.bf16.msra.mxu0 %v3611_v61 }
 0x28a   :  { %2847 = vmatprep.subr.bf16.mxu0 %v3608_v19 }
 0x28d   :  { %2849 = vmatpush3.bf16.msra.mxu0 %v3345_v13 }
 0x28e   :  { %2850 = vmatprep.subr.bf16.mxu0 %v3608_v19 }
 0x28f   :  { %v1374_v15 = vpop.f32.mrb[20].mxu1 }
 0x290   :  { %v2535_v49 = vpop.f32.mrb[21].mxu1 }
 0x291   :  { %2852 = vmatpush3.bf16.msra.mxu0 %v3357_v56 }
 0x292   :  { %2854 = vmatprep.subr.bf16.mxu0 %v3360_v48  ;;  %v2121_v48 = vld [vmem:[%s3594_s9 + $0x2] ss:$0 sm:$0xff] }
 0x294   :  { %2582 = vmatmul.mubr.msk.f32.vlgmr.msra.gmra.mrb[14].mxu0 %vm165_vm0, %v2127_v62 }
 0x295   :  { %2856 = vmatpush3.bf16.msra.mxu0 %v3366_v18  ;;  %1985 = vmatprep.mubr.f32.mxu0 %v1262_v1 }
 0x296   :  { %2858 = vmatprep.subr.bf16.mxu0 %v3369_v41 }
 0x299   :  { %2860 = vmatpush3.bf16.msra.mxu0 %v3377_v46  ;;  %v3612_v46 = vld [vmem:[#allocation11_spill] sm:$0xff] }
 0x29a   :  { %2862 = vmatprep.subr.bf16.mxu0 %v3381_v4 }
 0x29d   :  { %2864 = vmatpush3.bf16.msra.mxu0 %v3389_v58  ;;  %v2302_v6 = vpop.f32.mrb[8].mxu0  ;;  %v1521_v58 = vpop.f32.mrb[22].mxu1 }
 0x29e   :  { %v2303_v13 = vpop.f32.mrb[9].mxu0  ;;  %2866 = vmatprep.subr.bf16.mxu0 %v3394_v33  ;;  %v2540_v33 = vpop.f32.mrb[23].mxu1 }
 0x29f   :  { %v2304_v56 = vadd.f32 %v2303_v13, %v2302_v6 }
 0x2a1   :  { %v988_v3 = vadd.f32 %v2304_v56, %v917_v0  ;;  %2868 = vmatpush3.bf16.msra.mxu0 %v3401_v7 }
 0x2a2   :  { %2870 = vmatprep.subr.bf16.mxu0 %v3406_v35 }
 0x2a3   :  { %v1069_v18 = vadd.f32 %v1065_v29, %v988_v3  ;;  %v1646_v7 = vpop.f32.mrb[24].mxu1 }
 0x2a4   :  { %v2559_v35 = vpop.f32.mrb[25].mxu1 }
 0x2a5   :  { %v1078_v41 = vadd.f32 %v2121_v48, %v1069_v18  ;;  %2872 = vmatpush3.bf16.msra.mxu0 %v3411_v21 }
 0x2a6   :  { %2874 = vmatprep.subr.bf16.mxu0 %v3612_v46 }
 0x2a7   :  { %v1079_v4 = vmax.f32 %v1078_v41, 0.0 }
 0x2a9   :  { %1080 = vst [vmem:[%s3595_s10 + $0x10] sm:$0xf] %v1079_v4  ;;  %2876 = vmatpush3.bf16.msra.mxu0 %v3425_v30 }
 0x2aa   :  { %2878 = vmatprep.subr.bf16.mxu0 %v3428_v52 }
 0x2ad   :  { %2880 = vmatpush3.bf16.msra.mxu0 %v3439_v9 }
 0x2ae   :  { %2882 = vmatprep.subr.bf16.mxu0 %v3442_v31 }
 0x2b1   :  { %2884 = vmatpush3.bf16.msra.mxu0 %v3450_v34 }
 0x2b4   :  { %1986 = vmatmul.mubr.f32.vlgmr.msra.gmra.mrb[16].mxu0 %v1260_v50 }
 0x353   :  { %v2348_v21 = vpop.f32.mrb[10].mxu0 }
 0x354   :  { %v2349_v28 = vpop.f32.mrb[11].mxu0 }
 0x355   :  { %v2350_v42 = vadd.f32 %v2349_v28, %v2348_v21 }
 0x357   :  { %v1445_v19 = vadd.f32 %v2350_v42, %v1374_v15  ;;  %v2394_v47 = vpop.f32.mrb[26].mxu1  ;;  %v1793_v51 = vpop.f32.mrb[12].mxu0 }
 0x358   :  { %v2395_v30 = vpop.f32.mrb[27].mxu1  ;;  %v2564_v54 = vpop.f32.mrb[13].mxu0 }
 0x359   :  { %v1525_v52 = vadd.f32 %v1521_v58, %v1445_v19  ;;  %v2396_v57 = vadd.f32 %v2395_v30, %v2394_v47 }
 0x35b   :  { %v1533_v9 = vadd.f32 %v3502_v11, %v1525_v52  ;;  %v1717_v31 = vadd.f32 %v2396_v57, %v1646_v7  ;;  %v2064_v60 = vpop.f32.mrb[28].mxu1 }
 0x35c   :  { %v2588_v34 = vpop.f32.mrb[29].mxu1 }
 0x35d   :  { %v1534_v63 = vmax.f32 %v1533_v9, 0.0  ;;  %v1797_v2 = vadd.f32 %v1793_v51, %v1717_v31 }
 0x35f   :  { %2138 = vst [vmem:[%s3595_s10 + $0x18] sm:$0xff] %v1534_v63  ;;  %v1805_v5 = vadd.f32 %v3509_v22, %v1797_v2 }
 0x361   :  { %v1806_v8 = vmax.f32 %v1805_v5, 0.0 }
 0x363   :  { %2153 = vst [vmem:[%s3595_s10 + $0x20] sm:$0xff] %v1806_v8 }
 0x367   :  { %v1917_v14 = vpop.f32.mrb[14].mxu0 }
 0x368   :  { %v2583_v17 = vpop.f32.mrb[15].mxu0 }
 0x387   :  { %v2440_v20 = vpop.f32.mrb[16].mxu0 }
 0x388   :  { %v2441_v11 = vpop.f32.mrb[17].mxu0 }
 0x389   :  { %v2442_v23 = vadd.f32 %v2441_v11, %v2440_v20 }
 0x38b   :  { %v1988_v26 = vadd.f32 %v2442_v23, %v1917_v14 }
 0x38d   :  { %v2068_v29 = vadd.f32 %v2064_v60, %v1988_v26 }
 0x38f   :  { %v2076_v32 = vadd.f32 %v2121_v48, %v2068_v29 }
 0x391   :  { %v2077_v16 = vmax.f32 %v2076_v32, 0.0 }
 0x393   :  { %2168 = vst [vmem:[%s3595_s10 + $0x28] sm:$0xf] %v2077_v16 }
 0x394   :  { %2083 = vsyncpa [#allocation3], 1 }
 0x395   :  { %2084 = vsyncpa [#allocation5], 1 }

</bundles_post_ra>
